<compile_context>
chip_gen: v7x
topology: tpu7x:2x2x1
jax: 0.10.0
libtpu: 0.0.40
codegen_flags: <defaults>
</compile_context>

<pallas_src>
import functools

import jax
import jax.numpy as jnp
from jax.experimental import pallas as pl
from jax.experimental.pallas import tpu as pltpu

# ----- small-BERT config (synthetic, deterministic init) -----
HIDDEN = 32
HEADS = 4
HEAD_DIM = HIDDEN // HEADS
FFN = 64
LAYERS = 2
VOCAB = 100
TYPE_VOCAB = 2
MAX_POS = 64
NUM_LABELS = 3
LN_EPS = 1e-12

QKV_PAD = 128          # fused Q|K|V (3*HIDDEN = 96) zero-padded to a full 128-lane tile
CLS_PAD = 128          # classifier output padded to a full 128-lane tile


# ---------------------------------------------------------------------------
# Fused Pallas kernel: emb-LN -> [attn + FFN] x LAYERS -> pooler -> classifier
# ---------------------------------------------------------------------------
def _bert_fused_kernel(emb_ref, mask_ref, emb_g_ref, emb_b_ref,
                       wqkv_ref, bqkv_ref, wo_ref, bo_ref, ln1g_ref, ln1b_ref,
                       w1_ref, b1_ref, w2_ref, b2_ref, ln2g_ref, ln2b_ref,
                       pool_w_ref, pool_b_ref, cls_w_ref, cls_b_ref,
                       out_ref, *, batch, seq):
    f32 = jnp.float32

    def layernorm(x, g, b):
        mu = jnp.mean(x, axis=-1, keepdims=True)
        var = jnp.mean((x - mu) * (x - mu), axis=-1, keepdims=True)
        return (x - mu) * jax.lax.rsqrt(var + LN_EPS) * g + b

    def gelu(x):
        # tanh-approximate GELU (EUP-friendly); BERT reference uses erf-GELU.
        return 0.5 * x * (1.0 + jnp.tanh(0.7978845608028654 * (x + 0.044715 * x * x * x)))

    # --- embeddings LayerNorm (no fake zeros residual) ---
    h = layernorm(emb_ref[...].astype(f32), emb_g_ref[...], emb_b_ref[...])
    mask = mask_ref[...]                                   # (M, M) additive mask
    scale = 1.0 / jnp.sqrt(jnp.float32(HEAD_DIM))

    # --- encoder layers (static unroll; LAYERS=2) ---
    for l in range(LAYERS):
        # fused QKV projection: one matmul, lane-dense 128-wide output
        qkv = jnp.dot(h, wqkv_ref[l], preferred_element_type=f32) + bqkv_ref[l]

        ctx_heads = []
        for hh in range(HEADS):                            # static unroll; 2-D math per head
            lo = hh * HEAD_DIM
            q = qkv[:, lo:lo + HEAD_DIM]                   # (M, D)
            k = qkv[:, HIDDEN + lo:HIDDEN + lo + HEAD_DIM]
            v = qkv[:, 2 * HIDDEN + lo:2 * HIDDEN + lo + HEAD_DIM]
            # scores over the flattened batch*seq key axis; cross-batch/padded keys masked
            s = jax.lax.dot_general(q, k, (((1,), (1,)), ((), ())),
                                    preferred_element_type=f32) * scale + mask
            s = s - jnp.max(s, axis=-1, keepdims=True)
            p = jnp.exp(s)
            p = p * pl.reciprocal(jnp.sum(p, axis=-1, keepdims=True), approx=True)
            ctx_heads.append(jnp.dot(p, v, preferred_element_type=f32))
        ctx = jnp.concatenate(ctx_heads, axis=-1)          # (M, HIDDEN), merge-heads in VMEM

        attn_out = jnp.dot(ctx, wo_ref[l], preferred_element_type=f32) + bo_ref[l]
        h = layernorm(attn_out + h, ln1g_ref[l], ln1b_ref[l])

        inter = gelu(jnp.dot(h, w1_ref[l], preferred_element_type=f32) + b1_ref[l])
        ffn_out = jnp.dot(inter, w2_ref[l], preferred_element_type=f32) + b2_ref[l]
        h = layernorm(ffn_out + h, ln2g_ref[l], ln2b_ref[l])

    # --- pooler on [CLS] rows (row b*seq per batch) + classifier (lane-padded) ---
    cls_rows = jnp.concatenate([h[b * seq: b * seq + 1, :] for b in range(batch)], axis=0)
    pooled = jnp.tanh(jnp.dot(cls_rows, pool_w_ref[...], preferred_element_type=f32)
                      + pool_b_ref[...])
    # dropout(0.1) is identity in eval mode
    logits = jnp.dot(pooled, cls_w_ref[...], preferred_element_type=f32) + cls_b_ref[...]
    out_ref[...] = logits.astype(out_ref.dtype)


def _full_spec(shape):
    zeros = (0,) * len(shape)
    return pl.BlockSpec(shape, lambda i, _z=zeros: _z)


# ---------------------------------------------------------------------------
# Parameter init (deterministic)
# ---------------------------------------------------------------------------
def init_params(key):
    def nrm(k, shape, scale=0.02):
        return scale * jax.random.normal(k, shape, dtype=jnp.float32)

    keys = jax.random.split(key, 8 + LAYERS)
    p = {
        "word_emb": nrm(keys[0], (VOCAB, HIDDEN)),
        "pos_emb": nrm(keys[1], (MAX_POS, HIDDEN)),
        "type_emb": nrm(keys[2], (TYPE_VOCAB, HIDDEN)),
        "emb_ln_g": jnp.ones((HIDDEN,), jnp.float32),
        "emb_ln_b": jnp.zeros((HIDDEN,), jnp.float32),
        "pooler_w": nrm(keys[3], (HIDDEN, HIDDEN)),
        "pooler_b": jnp.zeros((HIDDEN,), jnp.float32),
        "cls_w": nrm(keys[4], (HIDDEN, NUM_LABELS)),
        "cls_b": jnp.zeros((NUM_LABELS,), jnp.float32),
        "layers": [],
    }
    for l in range(LAYERS):
        lk = jax.random.split(keys[8 + l], 6)
        p["layers"].append({
            "wq": nrm(lk[0], (HIDDEN, HIDDEN)), "bq": jnp.zeros((HIDDEN,), jnp.float32),
            "wk": nrm(lk[1], (HIDDEN, HIDDEN)), "bk": jnp.zeros((HIDDEN,), jnp.float32),
            "wv": nrm(lk[2], (HIDDEN, HIDDEN)), "bv": jnp.zeros((HIDDEN,), jnp.float32),
            "wo": nrm(lk[3], (HIDDEN, HIDDEN)), "bo": jnp.zeros((HIDDEN,), jnp.float32),
            "ln1_g": jnp.ones((HIDDEN,), jnp.float32), "ln1_b": jnp.zeros((HIDDEN,), jnp.float32),
            "w1": nrm(lk[4], (HIDDEN, FFN)), "b1": jnp.zeros((FFN,), jnp.float32),
            "w2": nrm(lk[5], (FFN, HIDDEN)), "b2": jnp.zeros((HIDDEN,), jnp.float32),
            "ln2_g": jnp.ones((HIDDEN,), jnp.float32), "ln2_b": jnp.zeros((HIDDEN,), jnp.float32),
        })
    return p


# ---------------------------------------------------------------------------
# Forward pass (BertMRCModel.forward)
# ---------------------------------------------------------------------------
def bert_mrc_forward(params, input_ids, attention_mask, token_type_ids):
    B, S = input_ids.shape
    M = B * S

    # --- embeddings: gathers are glue in plain JAX ---
    word = jnp.take(params["word_emb"], input_ids, axis=0)               # (B, S, H)
    pos = params["pos_emb"][:S][None, :, :]                              # (1, S, H)
    typ = jnp.take(params["type_emb"], token_type_ids, axis=0)           # (B, S, H)
    emb = (word + pos + typ).reshape(M, HIDDEN)

    # --- additive mask over the flattened key axis: padded keys AND cross-batch pairs
    #     get -1e4 (exp underflows to 0 -> identical to per-batch softmax over S keys) ---
    key_add = (1.0 - attention_mask.astype(jnp.float32)) * -10000.0      # (B, S)
    tok_batch = jnp.repeat(jnp.arange(B), S)                             # (M,)
    same_batch = tok_batch[:, None] == tok_batch[None, :]                # (M, M)
    mask2d = jnp.where(same_batch, key_add.reshape(M)[None, :], -10000.0)

    # --- pack / pad weights: fused, lane-padded QKV + stacked per-layer params ---
    L = params["layers"]
    pad_qkv = QKV_PAD - 3 * HIDDEN
    wqkv = jnp.stack([jnp.pad(jnp.concatenate([lp["wq"], lp["wk"], lp["wv"]], axis=1),
                              ((0, 0), (0, pad_qkv))) for lp in L])
    bqkv = jnp.stack([jnp.pad(jnp.concatenate([lp["bq"], lp["bk"], lp["bv"]]),
                              (0, pad_qkv)).reshape(1, QKV_PAD) for lp in L])
    wo = jnp.stack([lp["wo"] for lp in L])
    bo = jnp.stack([lp["bo"].reshape(1, HIDDEN) for lp in L])
    ln1g = jnp.stack([lp["ln1_g"].reshape(1, HIDDEN) for lp in L])
    ln1b = jnp.stack([lp["ln1_b"].reshape(1, HIDDEN) for lp in L])
    w1 = jnp.stack([lp["w1"] for lp in L])
    b1 = jnp.stack([lp["b1"].reshape(1, FFN) for lp in L])
    w2 = jnp.stack([lp["w2"] for lp in L])
    b2 = jnp.stack([lp["b2"].reshape(1, HIDDEN) for lp in L])
    ln2g = jnp.stack([lp["ln2_g"].reshape(1, HIDDEN) for lp in L])
    ln2b = jnp.stack([lp["ln2_b"].reshape(1, HIDDEN) for lp in L])

    cls_w = jnp.pad(params["cls_w"], ((0, 0), (0, CLS_PAD - NUM_LABELS)))
    cls_b = jnp.pad(params["cls_b"], (0, CLS_PAD - NUM_LABELS)).reshape(1, CLS_PAD)

    args = (emb, mask2d,
            params["emb_ln_g"].reshape(1, HIDDEN), params["emb_ln_b"].reshape(1, HIDDEN),
            wqkv, bqkv, wo, bo, ln1g, ln1b, w1, b1, w2, b2, ln2g, ln2b,
            params["pooler_w"], params["pooler_b"].reshape(1, HIDDEN),
            cls_w, cls_b)

    logits_pad = pl.pallas_call(
        functools.partial(_bert_fused_kernel, batch=B, seq=S),
        grid=(1,),
        out_shape=jax.ShapeDtypeStruct((B, CLS_PAD), jnp.float32),
        in_specs=[_full_spec(a.shape) for a in args],
        out_specs=_full_spec((B, CLS_PAD)),
        compiler_params=pltpu.CompilerParams(dimension_semantics=("arbitrary",)),
    )(*args)

    return logits_pad[:, :NUM_LABELS]


if __name__ == "__main__":
    key = jax.random.PRNGKey(0)
    pkey, ikey = jax.random.split(key)
    params = init_params(pkey)

    B, S = 2, 8
    input_ids = jax.random.randint(ikey, (B, S), 0, VOCAB, dtype=jnp.int32)
    attention_mask = jnp.concatenate(
        [jnp.ones((B, S - 2), jnp.int32), jnp.zeros((B, 2), jnp.int32)], axis=1)
    token_type_ids = jnp.concatenate(
        [jnp.zeros((B, S // 2), jnp.int32), jnp.ones((B, S // 2), jnp.int32)], axis=1)

    logits = bert_mrc_forward(params, input_ids, attention_mask, token_type_ids)
    jax.block_until_ready(logits)
    assert logits.shape == (B, NUM_LABELS)
    print("KERNEL_OK")
</pallas_src>

<mosaic_0001>
module attributes {stable_mosaic.version = 11 : i64} {
  func.func @_bert_fused_kernel(%arg0: i32, %arg1: memref<16x32xf32, #tpu.memory_space<vmem>>, %arg2: memref<16x16xf32, #tpu.memory_space<vmem>>, %arg3: memref<1x32xf32, #tpu.memory_space<vmem>>, %arg4: memref<1x32xf32, #tpu.memory_space<vmem>>, %arg5: memref<2x32x128xf32, #tpu.memory_space<vmem>>, %arg6: memref<2x1x128xf32, #tpu.memory_space<vmem>>, %arg7: memref<2x32x32xf32, #tpu.memory_space<vmem>>, %arg8: memref<2x1x32xf32, #tpu.memory_space<vmem>>, %arg9: memref<2x1x32xf32, #tpu.memory_space<vmem>>, %arg10: memref<2x1x32xf32, #tpu.memory_space<vmem>>, %arg11: memref<2x32x64xf32, #tpu.memory_space<vmem>>, %arg12: memref<2x1x64xf32, #tpu.memory_space<vmem>>, %arg13: memref<2x64x32xf32, #tpu.memory_space<vmem>>, %arg14: memref<2x1x32xf32, #tpu.memory_space<vmem>>, %arg15: memref<2x1x32xf32, #tpu.memory_space<vmem>>, %arg16: memref<2x1x32xf32, #tpu.memory_space<vmem>>, %arg17: memref<32x32xf32, #tpu.memory_space<vmem>>, %arg18: memref<1x32xf32, #tpu.memory_space<vmem>>, %arg19: memref<32x128xf32, #tpu.memory_space<vmem>>, %arg20: memref<1x128xf32, #tpu.memory_space<vmem>>, %arg21: memref<2x128xf32, #tpu.memory_space<vmem>>) attributes {dimension_semantics = [#tpu.dimension_semantics<arbitrary>], iteration_bounds = array<i64: 1>, scalar_prefetch = 0 : i64, scratch_operands = 0 : i64, tpu.core_type = #tpu.core_type<tc>, window_params = [{pipeline_mode = #tpu.pipeline_mode<synchronous>, transform_indices = @transform_0, window_bounds = array<i64: 16, 32>}, {pipeline_mode = #tpu.pipeline_mode<synchronous>, transform_indices = @transform_1, window_bounds = array<i64: 16, 16>}, {pipeline_mode = #tpu.pipeline_mode<synchronous>, transform_indices = @transform_2, window_bounds = array<i64: 1, 32>}, {pipeline_mode = #tpu.pipeline_mode<synchronous>, transform_indices = @transform_3, window_bounds = array<i64: 1, 32>}, {pipeline_mode = #tpu.pipeline_mode<synchronous>, transform_indices = @transform_4, window_bounds = array<i64: 2, 32, 128>}, {pipeline_mode = #tpu.pipeline_mode<synchronous>, transform_indices = @transform_5, window_bounds = array<i64: 2, 1, 128>}, {pipeline_mode = #tpu.pipeline_mode<synchronous>, transform_indices = @transform_6, window_bounds = array<i64: 2, 32, 32>}, {pipeline_mode = #tpu.pipeline_mode<synchronous>, transform_indices = @transform_7, window_bounds = array<i64: 2, 1, 32>}, {pipeline_mode = #tpu.pipeline_mode<synchronous>, transform_indices = @transform_8, window_bounds = array<i64: 2, 1, 32>}, {pipeline_mode = #tpu.pipeline_mode<synchronous>, transform_indices = @transform_9, window_bounds = array<i64: 2, 1, 32>}, {pipeline_mode = #tpu.pipeline_mode<synchronous>, transform_indices = @transform_10, window_bounds = array<i64: 2, 32, 64>}, {pipeline_mode = #tpu.pipeline_mode<synchronous>, transform_indices = @transform_11, window_bounds = array<i64: 2, 1, 64>}, {pipeline_mode = #tpu.pipeline_mode<synchronous>, transform_indices = @transform_12, window_bounds = array<i64: 2, 64, 32>}, {pipeline_mode = #tpu.pipeline_mode<synchronous>, transform_indices = @transform_13, window_bounds = array<i64: 2, 1, 32>}, {pipeline_mode = #tpu.pipeline_mode<synchronous>, transform_indices = @transform_14, window_bounds = array<i64: 2, 1, 32>}, {pipeline_mode = #tpu.pipeline_mode<synchronous>, transform_indices = @transform_15, window_bounds = array<i64: 2, 1, 32>}, {pipeline_mode = #tpu.pipeline_mode<synchronous>, transform_indices = @transform_16, window_bounds = array<i64: 32, 32>}, {pipeline_mode = #tpu.pipeline_mode<synchronous>, transform_indices = @transform_17, window_bounds = array<i64: 1, 32>}, {pipeline_mode = #tpu.pipeline_mode<synchronous>, transform_indices = @transform_18, window_bounds = array<i64: 32, 128>}, {pipeline_mode = #tpu.pipeline_mode<synchronous>, transform_indices = @transform_19, window_bounds = array<i64: 1, 128>}, {pipeline_mode = #tpu.pipeline_mode<synchronous>, transform_indices = @transform_20, window_bounds = array<i64: 2, 128>}]} {
    %c0 = arith.constant 0 : index
    %c0_0 = arith.constant 0 : index
    %0 = vector.load %arg1[%c0, %c0_0] : memref<16x32xf32, #tpu.memory_space<vmem>>, vector<16x32xf32>
    %c0_1 = arith.constant 0 : index
    %c0_2 = arith.constant 0 : index
    %1 = vector.load %arg3[%c0_1, %c0_2] : memref<1x32xf32, #tpu.memory_space<vmem>>, vector<1x32xf32>
    %c0_3 = arith.constant 0 : index
    %c0_4 = arith.constant 0 : index
    %2 = vector.load %arg4[%c0_3, %c0_4] : memref<1x32xf32, #tpu.memory_space<vmem>>, vector<1x32xf32>
    %cst = arith.constant dense<0.000000e+00> : vector<16xf32>
    %3 = vector.multi_reduction <add>, %0, %cst [1] : vector<16x32xf32> to vector<16xf32>
    %4 = vector.shape_cast %3 : vector<16xf32> to vector<16x1xf32>
    %cst_5 = arith.constant 3.200000e+01 : f32
    %5 = vector.broadcast %cst_5 : f32 to vector<16x1xf32>
    %6 = arith.divf %4, %5 : vector<16x1xf32>
    %7 = vector.broadcast %6 : vector<16x1xf32> to vector<16x32xf32>
    %8 = arith.subf %0, %7 : vector<16x32xf32>
    %9 = vector.broadcast %6 : vector<16x1xf32> to vector<16x32xf32>
    %10 = arith.subf %0, %9 : vector<16x32xf32>
    %11 = arith.mulf %8, %10 : vector<16x32xf32>
    %cst_6 = arith.constant dense<0.000000e+00> : vector<16xf32>
    %12 = vector.multi_reduction <add>, %11, %cst_6 [1] : vector<16x32xf32> to vector<16xf32>
    %13 = vector.shape_cast %12 : vector<16xf32> to vector<16x1xf32>
    %cst_7 = arith.constant 3.200000e+01 : f32
    %14 = vector.broadcast %cst_7 : f32 to vector<16x1xf32>
    %15 = arith.divf %13, %14 : vector<16x1xf32>
    %16 = vector.broadcast %6 : vector<16x1xf32> to vector<16x32xf32>
    %17 = arith.subf %0, %16 : vector<16x32xf32>
    %cst_8 = arith.constant 9.99999996E-13 : f32
    %18 = vector.broadcast %cst_8 : f32 to vector<16x1xf32>
    %19 = arith.addf %15, %18 : vector<16x1xf32>
    %20 = math.rsqrt %19 : vector<16x1xf32>
    %21 = vector.broadcast %20 : vector<16x1xf32> to vector<16x32xf32>
    %22 = arith.mulf %17, %21 : vector<16x32xf32>
    %23 = vector.broadcast %1 : vector<1x32xf32> to vector<16x32xf32>
    %24 = arith.mulf %22, %23 : vector<16x32xf32>
    %25 = vector.broadcast %2 : vector<1x32xf32> to vector<16x32xf32>
    %26 = arith.addf %24, %25 : vector<16x32xf32>
    %c0_9 = arith.constant 0 : index
    %c0_10 = arith.constant 0 : index
    %27 = vector.load %arg2[%c0_9, %c0_10] : memref<16x16xf32, #tpu.memory_space<vmem>>, vector<16x16xf32>
    %cst_11 = arith.constant 8.000000e+00 : f32
    %28 = math.sqrt %cst_11 : f32
    %cst_12 = arith.constant 1.000000e+00 : f32
    %29 = arith.divf %cst_12, %28 : f32
    %c0_13 = arith.constant 0 : index
    %c0_14 = arith.constant 0 : index
    %c0_15 = arith.constant 0 : index
    %30 = vector.load %arg5[%c0_13, %c0_14, %c0_15] : memref<2x32x128xf32, #tpu.memory_space<vmem>>, vector<1x32x128xf32>
    %31 = vector.shape_cast %30 : vector<1x32x128xf32> to vector<32x128xf32>
    %cst_16 = arith.constant dense<0.000000e+00> : vector<16x128xf32>
    %32 = tpu.matmul %26, %31, %cst_16 {dimension_numbers = #tpu.dot_dimension_numbers<[1], [0], [0], [1], [0, 0, 1, 1], [], []>} : vector<16x32xf32>, vector<32x128xf32>, vector<16x128xf32> -> vector<16x128xf32>
    %c0_17 = arith.constant 0 : index
    %c0_18 = arith.constant 0 : index
    %c0_19 = arith.constant 0 : index
    %33 = vector.load %arg6[%c0_17, %c0_18, %c0_19] : memref<2x1x128xf32, #tpu.memory_space<vmem>>, vector<1x1x128xf32>
    %34 = vector.shape_cast %33 : vector<1x1x128xf32> to vector<1x128xf32>
    %35 = vector.broadcast %34 : vector<1x128xf32> to vector<16x128xf32>
    %36 = arith.addf %32, %35 : vector<16x128xf32>
    %37 = vector.extract_strided_slice %36 {offsets = [0, 0], sizes = [16, 8], strides = [1, 1]} : vector<16x128xf32> to vector<16x8xf32>
    %38 = vector.extract_strided_slice %36 {offsets = [0, 32], sizes = [16, 8], strides = [1, 1]} : vector<16x128xf32> to vector<16x8xf32>
    %39 = vector.extract_strided_slice %36 {offsets = [0, 64], sizes = [16, 8], strides = [1, 1]} : vector<16x128xf32> to vector<16x8xf32>
    %cst_20 = arith.constant dense<0.000000e+00> : vector<16x16xf32>
    %40 = tpu.matmul %37, %38, %cst_20 {dimension_numbers = #tpu.dot_dimension_numbers<[1], [1], [0], [0], [0, 0, 1, 0], [], []>} : vector<16x8xf32>, vector<16x8xf32>, vector<16x16xf32> -> vector<16x16xf32>
    %41 = vector.broadcast %29 : f32 to vector<16x16xf32>
    %42 = arith.mulf %40, %41 : vector<16x16xf32>
    %43 = arith.addf %42, %27 : vector<16x16xf32>
    %cst_21 = arith.constant dense<0xFF800000> : vector<16xf32>
    %44 = vector.multi_reduction <maximumf>, %43, %cst_21 [1] : vector<16x16xf32> to vector<16xf32>
    %45 = vector.shape_cast %44 : vector<16xf32> to vector<16x1xf32>
    %46 = vector.broadcast %45 : vector<16x1xf32> to vector<16x16xf32>
    %47 = arith.subf %43, %46 : vector<16x16xf32>
    %48 = math.exp %47 : vector<16x16xf32>
    %cst_22 = arith.constant dense<0.000000e+00> : vector<16xf32>
    %49 = vector.multi_reduction <add>, %48, %cst_22 [1] : vector<16x16xf32> to vector<16xf32>
    %50 = vector.shape_cast %49 : vector<16xf32> to vector<16x1xf32>
    %51 = tpu.reciprocal %50 {approx = true} : vector<16x1xf32> -> vector<16x1xf32>
    %52 = vector.broadcast %51 : vector<16x1xf32> to vector<16x16xf32>
    %53 = arith.mulf %48, %52 : vector<16x16xf32>
    %cst_23 = arith.constant dense<0.000000e+00> : vector<16x8xf32>
    %54 = tpu.matmul %53, %39, %cst_23 {dimension_numbers = #tpu.dot_dimension_numbers<[1], [0], [0], [1], [0, 0, 1, 1], [], []>} : vector<16x16xf32>, vector<16x8xf32>, vector<16x8xf32> -> vector<16x8xf32>
    %55 = vector.extract_strided_slice %36 {offsets = [0, 8], sizes = [16, 8], strides = [1, 1]} : vector<16x128xf32> to vector<16x8xf32>
    %56 = vector.extract_strided_slice %36 {offsets = [0, 40], sizes = [16, 8], strides = [1, 1]} : vector<16x128xf32> to vector<16x8xf32>
    %57 = vector.extract_strided_slice %36 {offsets = [0, 72], sizes = [16, 8], strides = [1, 1]} : vector<16x128xf32> to vector<16x8xf32>
    %cst_24 = arith.constant dense<0.000000e+00> : vector<16x16xf32>
    %58 = tpu.matmul %55, %56, %cst_24 {dimension_numbers = #tpu.dot_dimension_numbers<[1], [1], [0], [0], [0, 0, 1, 0], [], []>} : vector<16x8xf32>, vector<16x8xf32>, vector<16x16xf32> -> vector<16x16xf32>
    %59 = vector.broadcast %29 : f32 to vector<16x16xf32>
    %60 = arith.mulf %58, %59 : vector<16x16xf32>
    %61 = arith.addf %60, %27 : vector<16x16xf32>
    %cst_25 = arith.constant dense<0xFF800000> : vector<16xf32>
    %62 = vector.multi_reduction <maximumf>, %61, %cst_25 [1] : vector<16x16xf32> to vector<16xf32>
    %63 = vector.shape_cast %62 : vector<16xf32> to vector<16x1xf32>
    %64 = vector.broadcast %63 : vector<16x1xf32> to vector<16x16xf32>
    %65 = arith.subf %61, %64 : vector<16x16xf32>
    %66 = math.exp %65 : vector<16x16xf32>
    %cst_26 = arith.constant dense<0.000000e+00> : vector<16xf32>
    %67 = vector.multi_reduction <add>, %66, %cst_26 [1] : vector<16x16xf32> to vector<16xf32>
    %68 = vector.shape_cast %67 : vector<16xf32> to vector<16x1xf32>
    %69 = tpu.reciprocal %68 {approx = true} : vector<16x1xf32> -> vector<16x1xf32>
    %70 = vector.broadcast %69 : vector<16x1xf32> to vector<16x16xf32>
    %71 = arith.mulf %66, %70 : vector<16x16xf32>
    %cst_27 = arith.constant dense<0.000000e+00> : vector<16x8xf32>
    %72 = tpu.matmul %71, %57, %cst_27 {dimension_numbers = #tpu.dot_dimension_numbers<[1], [0], [0], [1], [0, 0, 1, 1], [], []>} : vector<16x16xf32>, vector<16x8xf32>, vector<16x8xf32> -> vector<16x8xf32>
    %73 = vector.extract_strided_slice %36 {offsets = [0, 16], sizes = [16, 8], strides = [1, 1]} : vector<16x128xf32> to vector<16x8xf32>
    %74 = vector.extract_strided_slice %36 {offsets = [0, 48], sizes = [16, 8], strides = [1, 1]} : vector<16x128xf32> to vector<16x8xf32>
    %75 = vector.extract_strided_slice %36 {offsets = [0, 80], sizes = [16, 8], strides = [1, 1]} : vector<16x128xf32> to vector<16x8xf32>
    %cst_28 = arith.constant dense<0.000000e+00> : vector<16x16xf32>
    %76 = tpu.matmul %73, %74, %cst_28 {dimension_numbers = #tpu.dot_dimension_numbers<[1], [1], [0], [0], [0, 0, 1, 0], [], []>} : vector<16x8xf32>, vector<16x8xf32>, vector<16x16xf32> -> vector<16x16xf32>
    %77 = vector.broadcast %29 : f32 to vector<16x16xf32>
    %78 = arith.mulf %76, %77 : vector<16x16xf32>
    %79 = arith.addf %78, %27 : vector<16x16xf32>
    %cst_29 = arith.constant dense<0xFF800000> : vector<16xf32>
    %80 = vector.multi_reduction <maximumf>, %79, %cst_29 [1] : vector<16x16xf32> to vector<16xf32>
    %81 = vector.shape_cast %80 : vector<16xf32> to vector<16x1xf32>
    %82 = vector.broadcast %81 : vector<16x1xf32> to vector<16x16xf32>
    %83 = arith.subf %79, %82 : vector<16x16xf32>
    %84 = math.exp %83 : vector<16x16xf32>
    %cst_30 = arith.constant dense<0.000000e+00> : vector<16xf32>
    %85 = vector.multi_reduction <add>, %84, %cst_30 [1] : vector<16x16xf32> to vector<16xf32>
    %86 = vector.shape_cast %85 : vector<16xf32> to vector<16x1xf32>
    %87 = tpu.reciprocal %86 {approx = true} : vector<16x1xf32> -> vector<16x1xf32>
    %88 = vector.broadcast %87 : vector<16x1xf32> to vector<16x16xf32>
    %89 = arith.mulf %84, %88 : vector<16x16xf32>
    %cst_31 = arith.constant dense<0.000000e+00> : vector<16x8xf32>
    %90 = tpu.matmul %89, %75, %cst_31 {dimension_numbers = #tpu.dot_dimension_numbers<[1], [0], [0], [1], [0, 0, 1, 1], [], []>} : vector<16x16xf32>, vector<16x8xf32>, vector<16x8xf32> -> vector<16x8xf32>
    %91 = vector.extract_strided_slice %36 {offsets = [0, 24], sizes = [16, 8], strides = [1, 1]} : vector<16x128xf32> to vector<16x8xf32>
    %92 = vector.extract_strided_slice %36 {offsets = [0, 56], sizes = [16, 8], strides = [1, 1]} : vector<16x128xf32> to vector<16x8xf32>
    %93 = vector.extract_strided_slice %36 {offsets = [0, 88], sizes = [16, 8], strides = [1, 1]} : vector<16x128xf32> to vector<16x8xf32>
    %cst_32 = arith.constant dense<0.000000e+00> : vector<16x16xf32>
    %94 = tpu.matmul %91, %92, %cst_32 {dimension_numbers = #tpu.dot_dimension_numbers<[1], [1], [0], [0], [0, 0, 1, 0], [], []>} : vector<16x8xf32>, vector<16x8xf32>, vector<16x16xf32> -> vector<16x16xf32>
    %95 = vector.broadcast %29 : f32 to vector<16x16xf32>
    %96 = arith.mulf %94, %95 : vector<16x16xf32>
    %97 = arith.addf %96, %27 : vector<16x16xf32>
    %cst_33 = arith.constant dense<0xFF800000> : vector<16xf32>
    %98 = vector.multi_reduction <maximumf>, %97, %cst_33 [1] : vector<16x16xf32> to vector<16xf32>
    %99 = vector.shape_cast %98 : vector<16xf32> to vector<16x1xf32>
    %100 = vector.broadcast %99 : vector<16x1xf32> to vector<16x16xf32>
    %101 = arith.subf %97, %100 : vector<16x16xf32>
    %102 = math.exp %101 : vector<16x16xf32>
    %cst_34 = arith.constant dense<0.000000e+00> : vector<16xf32>
    %103 = vector.multi_reduction <add>, %102, %cst_34 [1] : vector<16x16xf32> to vector<16xf32>
    %104 = vector.shape_cast %103 : vector<16xf32> to vector<16x1xf32>
    %105 = tpu.reciprocal %104 {approx = true} : vector<16x1xf32> -> vector<16x1xf32>
    %106 = vector.broadcast %105 : vector<16x1xf32> to vector<16x16xf32>
    %107 = arith.mulf %102, %106 : vector<16x16xf32>
    %cst_35 = arith.constant dense<0.000000e+00> : vector<16x8xf32>
    %108 = tpu.matmul %107, %93, %cst_35 {dimension_numbers = #tpu.dot_dimension_numbers<[1], [0], [0], [1], [0, 0, 1, 1], [], []>} : vector<16x16xf32>, vector<16x8xf32>, vector<16x8xf32> -> vector<16x8xf32>
    %109 = tpu.concatenate %54, %72, %90, %108 in 1 : vector<16x8xf32>, vector<16x8xf32>, vector<16x8xf32>, vector<16x8xf32> -> vector<16x32xf32>
    %c0_36 = arith.constant 0 : index
    %c0_37 = arith.constant 0 : index
    %c0_38 = arith.constant 0 : index
    %110 = vector.load %arg7[%c0_36, %c0_37, %c0_38] : memref<2x32x32xf32, #tpu.memory_space<vmem>>, vector<1x32x32xf32>
    %111 = vector.shape_cast %110 : vector<1x32x32xf32> to vector<32x32xf32>
    %cst_39 = arith.constant dense<0.000000e+00> : vector<16x32xf32>
    %112 = tpu.matmul %109, %111, %cst_39 {dimension_numbers = #tpu.dot_dimension_numbers<[1], [0], [0], [1], [0, 0, 1, 1], [], []>} : vector<16x32xf32>, vector<32x32xf32>, vector<16x32xf32> -> vector<16x32xf32>
    %c0_40 = arith.constant 0 : index
    %c0_41 = arith.constant 0 : index
    %c0_42 = arith.constant 0 : index
    %113 = vector.load %arg8[%c0_40, %c0_41, %c0_42] : memref<2x1x32xf32, #tpu.memory_space<vmem>>, vector<1x1x32xf32>
    %114 = vector.shape_cast %113 : vector<1x1x32xf32> to vector<1x32xf32>
    %115 = vector.broadcast %114 : vector<1x32xf32> to vector<16x32xf32>
    %116 = arith.addf %112, %115 : vector<16x32xf32>
    %117 = arith.addf %116, %26 : vector<16x32xf32>
    %c0_43 = arith.constant 0 : index
    %c0_44 = arith.constant 0 : index
    %c0_45 = arith.constant 0 : index
    %118 = vector.load %arg9[%c0_43, %c0_44, %c0_45] : memref<2x1x32xf32, #tpu.memory_space<vmem>>, vector<1x1x32xf32>
    %119 = vector.shape_cast %118 : vector<1x1x32xf32> to vector<1x32xf32>
    %c0_46 = arith.constant 0 : index
    %c0_47 = arith.constant 0 : index
    %c0_48 = arith.constant 0 : index
    %120 = vector.load %arg10[%c0_46, %c0_47, %c0_48] : memref<2x1x32xf32, #tpu.memory_space<vmem>>, vector<1x1x32xf32>
    %121 = vector.shape_cast %120 : vector<1x1x32xf32> to vector<1x32xf32>
    %cst_49 = arith.constant dense<0.000000e+00> : vector<16xf32>
    %122 = vector.multi_reduction <add>, %117, %cst_49 [1] : vector<16x32xf32> to vector<16xf32>
    %123 = vector.shape_cast %122 : vector<16xf32> to vector<16x1xf32>
    %cst_50 = arith.constant 3.200000e+01 : f32
    %124 = vector.broadcast %cst_50 : f32 to vector<16x1xf32>
    %125 = arith.divf %123, %124 : vector<16x1xf32>
    %126 = vector.broadcast %125 : vector<16x1xf32> to vector<16x32xf32>
    %127 = arith.subf %117, %126 : vector<16x32xf32>
    %128 = vector.broadcast %125 : vector<16x1xf32> to vector<16x32xf32>
    %129 = arith.subf %117, %128 : vector<16x32xf32>
    %130 = arith.mulf %127, %129 : vector<16x32xf32>
    %cst_51 = arith.constant dense<0.000000e+00> : vector<16xf32>
    %131 = vector.multi_reduction <add>, %130, %cst_51 [1] : vector<16x32xf32> to vector<16xf32>
    %132 = vector.shape_cast %131 : vector<16xf32> to vector<16x1xf32>
    %cst_52 = arith.constant 3.200000e+01 : f32
    %133 = vector.broadcast %cst_52 : f32 to vector<16x1xf32>
    %134 = arith.divf %132, %133 : vector<16x1xf32>
    %135 = vector.broadcast %125 : vector<16x1xf32> to vector<16x32xf32>
    %136 = arith.subf %117, %135 : vector<16x32xf32>
    %cst_53 = arith.constant 9.99999996E-13 : f32
    %137 = vector.broadcast %cst_53 : f32 to vector<16x1xf32>
    %138 = arith.addf %134, %137 : vector<16x1xf32>
    %139 = math.rsqrt %138 : vector<16x1xf32>
    %140 = vector.broadcast %139 : vector<16x1xf32> to vector<16x32xf32>
    %141 = arith.mulf %136, %140 : vector<16x32xf32>
    %142 = vector.broadcast %119 : vector<1x32xf32> to vector<16x32xf32>
    %143 = arith.mulf %141, %142 : vector<16x32xf32>
    %144 = vector.broadcast %121 : vector<1x32xf32> to vector<16x32xf32>
    %145 = arith.addf %143, %144 : vector<16x32xf32>
    %c0_54 = arith.constant 0 : index
    %c0_55 = arith.constant 0 : index
    %c0_56 = arith.constant 0 : index
    %146 = vector.load %arg11[%c0_54, %c0_55, %c0_56] : memref<2x32x64xf32, #tpu.memory_space<vmem>>, vector<1x32x64xf32>
    %147 = vector.shape_cast %146 : vector<1x32x64xf32> to vector<32x64xf32>
    %cst_57 = arith.constant dense<0.000000e+00> : vector<16x64xf32>
    %148 = tpu.matmul %145, %147, %cst_57 {dimension_numbers = #tpu.dot_dimension_numbers<[1], [0], [0], [1], [0, 0, 1, 1], [], []>} : vector<16x32xf32>, vector<32x64xf32>, vector<16x64xf32> -> vector<16x64xf32>
    %c0_58 = arith.constant 0 : index
    %c0_59 = arith.constant 0 : index
    %c0_60 = arith.constant 0 : index
    %149 = vector.load %arg12[%c0_58, %c0_59, %c0_60] : memref<2x1x64xf32, #tpu.memory_space<vmem>>, vector<1x1x64xf32>
    %150 = vector.shape_cast %149 : vector<1x1x64xf32> to vector<1x64xf32>
    %151 = vector.broadcast %150 : vector<1x64xf32> to vector<16x64xf32>
    %152 = arith.addf %148, %151 : vector<16x64xf32>
    %cst_61 = arith.constant 5.000000e-01 : f32
    %153 = vector.broadcast %cst_61 : f32 to vector<16x64xf32>
    %154 = arith.mulf %153, %152 : vector<16x64xf32>
    %cst_62 = arith.constant 4.471500e-02 : f32
    %155 = vector.broadcast %cst_62 : f32 to vector<16x64xf32>
    %156 = arith.mulf %155, %152 : vector<16x64xf32>
    %157 = arith.mulf %156, %152 : vector<16x64xf32>
    %158 = arith.mulf %157, %152 : vector<16x64xf32>
    %159 = arith.addf %152, %158 : vector<16x64xf32>
    %cst_63 = arith.constant 0.797884583 : f32
    %160 = vector.broadcast %cst_63 : f32 to vector<16x64xf32>
    %161 = arith.mulf %160, %159 : vector<16x64xf32>
    %162 = math.tanh %161 : vector<16x64xf32>
    %cst_64 = arith.constant 1.000000e+00 : f32
    %163 = vector.broadcast %cst_64 : f32 to vector<16x64xf32>
    %164 = arith.addf %163, %162 : vector<16x64xf32>
    %165 = arith.mulf %154, %164 : vector<16x64xf32>
    %c0_65 = arith.constant 0 : index
    %c0_66 = arith.constant 0 : index
    %c0_67 = arith.constant 0 : index
    %166 = vector.load %arg13[%c0_65, %c0_66, %c0_67] : memref<2x64x32xf32, #tpu.memory_space<vmem>>, vector<1x64x32xf32>
    %167 = vector.shape_cast %166 : vector<1x64x32xf32> to vector<64x32xf32>
    %cst_68 = arith.constant dense<0.000000e+00> : vector<16x32xf32>
    %168 = tpu.matmul %165, %167, %cst_68 {dimension_numbers = #tpu.dot_dimension_numbers<[1], [0], [0], [1], [0, 0, 1, 1], [], []>} : vector<16x64xf32>, vector<64x32xf32>, vector<16x32xf32> -> vector<16x32xf32>
    %c0_69 = arith.constant 0 : index
    %c0_70 = arith.constant 0 : index
    %c0_71 = arith.constant 0 : index
    %169 = vector.load %arg14[%c0_69, %c0_70, %c0_71] : memref<2x1x32xf32, #tpu.memory_space<vmem>>, vector<1x1x32xf32>
    %170 = vector.shape_cast %169 : vector<1x1x32xf32> to vector<1x32xf32>
    %171 = vector.broadcast %170 : vector<1x32xf32> to vector<16x32xf32>
    %172 = arith.addf %168, %171 : vector<16x32xf32>
    %173 = arith.addf %172, %145 : vector<16x32xf32>
    %c0_72 = arith.constant 0 : index
    %c0_73 = arith.constant 0 : index
    %c0_74 = arith.constant 0 : index
    %174 = vector.load %arg15[%c0_72, %c0_73, %c0_74] : memref<2x1x32xf32, #tpu.memory_space<vmem>>, vector<1x1x32xf32>
    %175 = vector.shape_cast %174 : vector<1x1x32xf32> to vector<1x32xf32>
    %c0_75 = arith.constant 0 : index
    %c0_76 = arith.constant 0 : index
    %c0_77 = arith.constant 0 : index
    %176 = vector.load %arg16[%c0_75, %c0_76, %c0_77] : memref<2x1x32xf32, #tpu.memory_space<vmem>>, vector<1x1x32xf32>
    %177 = vector.shape_cast %176 : vector<1x1x32xf32> to vector<1x32xf32>
    %cst_78 = arith.constant dense<0.000000e+00> : vector<16xf32>
    %178 = vector.multi_reduction <add>, %173, %cst_78 [1] : vector<16x32xf32> to vector<16xf32>
    %179 = vector.shape_cast %178 : vector<16xf32> to vector<16x1xf32>
    %cst_79 = arith.constant 3.200000e+01 : f32
    %180 = vector.broadcast %cst_79 : f32 to vector<16x1xf32>
    %181 = arith.divf %179, %180 : vector<16x1xf32>
    %182 = vector.broadcast %181 : vector<16x1xf32> to vector<16x32xf32>
    %183 = arith.subf %173, %182 : vector<16x32xf32>
    %184 = vector.broadcast %181 : vector<16x1xf32> to vector<16x32xf32>
    %185 = arith.subf %173, %184 : vector<16x32xf32>
    %186 = arith.mulf %183, %185 : vector<16x32xf32>
    %cst_80 = arith.constant dense<0.000000e+00> : vector<16xf32>
    %187 = vector.multi_reduction <add>, %186, %cst_80 [1] : vector<16x32xf32> to vector<16xf32>
    %188 = vector.shape_cast %187 : vector<16xf32> to vector<16x1xf32>
    %cst_81 = arith.constant 3.200000e+01 : f32
    %189 = vector.broadcast %cst_81 : f32 to vector<16x1xf32>
    %190 = arith.divf %188, %189 : vector<16x1xf32>
    %191 = vector.broadcast %181 : vector<16x1xf32> to vector<16x32xf32>
    %192 = arith.subf %173, %191 : vector<16x32xf32>
    %cst_82 = arith.constant 9.99999996E-13 : f32
    %193 = vector.broadcast %cst_82 : f32 to vector<16x1xf32>
    %194 = arith.addf %190, %193 : vector<16x1xf32>
    %195 = math.rsqrt %194 : vector<16x1xf32>
    %196 = vector.broadcast %195 : vector<16x1xf32> to vector<16x32xf32>
    %197 = arith.mulf %192, %196 : vector<16x32xf32>
    %198 = vector.broadcast %175 : vector<1x32xf32> to vector<16x32xf32>
    %199 = arith.mulf %197, %198 : vector<16x32xf32>
    %200 = vector.broadcast %177 : vector<1x32xf32> to vector<16x32xf32>
    %201 = arith.addf %199, %200 : vector<16x32xf32>
    %c1 = arith.constant 1 : index
    %c0_83 = arith.constant 0 : index
    %c0_84 = arith.constant 0 : index
    %202 = vector.load %arg5[%c1, %c0_83, %c0_84] : memref<2x32x128xf32, #tpu.memory_space<vmem>>, vector<1x32x128xf32>
    %203 = vector.shape_cast %202 : vector<1x32x128xf32> to vector<32x128xf32>
    %cst_85 = arith.constant dense<0.000000e+00> : vector<16x128xf32>
    %204 = tpu.matmul %201, %203, %cst_85 {dimension_numbers = #tpu.dot_dimension_numbers<[1], [0], [0], [1], [0, 0, 1, 1], [], []>} : vector<16x32xf32>, vector<32x128xf32>, vector<16x128xf32> -> vector<16x128xf32>
    %c1_86 = arith.constant 1 : index
    %c0_87 = arith.constant 0 : index
    %c0_88 = arith.constant 0 : index
    %205 = vector.load %arg6[%c1_86, %c0_87, %c0_88] : memref<2x1x128xf32, #tpu.memory_space<vmem>>, vector<1x1x128xf32>
    %206 = vector.shape_cast %205 : vector<1x1x128xf32> to vector<1x128xf32>
    %207 = vector.broadcast %206 : vector<1x128xf32> to vector<16x128xf32>
    %208 = arith.addf %204, %207 : vector<16x128xf32>
    %209 = vector.extract_strided_slice %208 {offsets = [0, 0], sizes = [16, 8], strides = [1, 1]} : vector<16x128xf32> to vector<16x8xf32>
    %210 = vector.extract_strided_slice %208 {offsets = [0, 32], sizes = [16, 8], strides = [1, 1]} : vector<16x128xf32> to vector<16x8xf32>
    %211 = vector.extract_strided_slice %208 {offsets = [0, 64], sizes = [16, 8], strides = [1, 1]} : vector<16x128xf32> to vector<16x8xf32>
    %cst_89 = arith.constant dense<0.000000e+00> : vector<16x16xf32>
    %212 = tpu.matmul %209, %210, %cst_89 {dimension_numbers = #tpu.dot_dimension_numbers<[1], [1], [0], [0], [0, 0, 1, 0], [], []>} : vector<16x8xf32>, vector<16x8xf32>, vector<16x16xf32> -> vector<16x16xf32>
    %213 = vector.broadcast %29 : f32 to vector<16x16xf32>
    %214 = arith.mulf %212, %213 : vector<16x16xf32>
    %215 = arith.addf %214, %27 : vector<16x16xf32>
    %cst_90 = arith.constant dense<0xFF800000> : vector<16xf32>
    %216 = vector.multi_reduction <maximumf>, %215, %cst_90 [1] : vector<16x16xf32> to vector<16xf32>
    %217 = vector.shape_cast %216 : vector<16xf32> to vector<16x1xf32>
    %218 = vector.broadcast %217 : vector<16x1xf32> to vector<16x16xf32>
    %219 = arith.subf %215, %218 : vector<16x16xf32>
    %220 = math.exp %219 : vector<16x16xf32>
    %cst_91 = arith.constant dense<0.000000e+00> : vector<16xf32>
    %221 = vector.multi_reduction <add>, %220, %cst_91 [1] : vector<16x16xf32> to vector<16xf32>
    %222 = vector.shape_cast %221 : vector<16xf32> to vector<16x1xf32>
    %223 = tpu.reciprocal %222 {approx = true} : vector<16x1xf32> -> vector<16x1xf32>
    %224 = vector.broadcast %223 : vector<16x1xf32> to vector<16x16xf32>
    %225 = arith.mulf %220, %224 : vector<16x16xf32>
    %cst_92 = arith.constant dense<0.000000e+00> : vector<16x8xf32>
    %226 = tpu.matmul %225, %211, %cst_92 {dimension_numbers = #tpu.dot_dimension_numbers<[1], [0], [0], [1], [0, 0, 1, 1], [], []>} : vector<16x16xf32>, vector<16x8xf32>, vector<16x8xf32> -> vector<16x8xf32>
    %227 = vector.extract_strided_slice %208 {offsets = [0, 8], sizes = [16, 8], strides = [1, 1]} : vector<16x128xf32> to vector<16x8xf32>
    %228 = vector.extract_strided_slice %208 {offsets = [0, 40], sizes = [16, 8], strides = [1, 1]} : vector<16x128xf32> to vector<16x8xf32>
    %229 = vector.extract_strided_slice %208 {offsets = [0, 72], sizes = [16, 8], strides = [1, 1]} : vector<16x128xf32> to vector<16x8xf32>
    %cst_93 = arith.constant dense<0.000000e+00> : vector<16x16xf32>
    %230 = tpu.matmul %227, %228, %cst_93 {dimension_numbers = #tpu.dot_dimension_numbers<[1], [1], [0], [0], [0, 0, 1, 0], [], []>} : vector<16x8xf32>, vector<16x8xf32>, vector<16x16xf32> -> vector<16x16xf32>
    %231 = vector.broadcast %29 : f32 to vector<16x16xf32>
    %232 = arith.mulf %230, %231 : vector<16x16xf32>
    %233 = arith.addf %232, %27 : vector<16x16xf32>
    %cst_94 = arith.constant dense<0xFF800000> : vector<16xf32>
    %234 = vector.multi_reduction <maximumf>, %233, %cst_94 [1] : vector<16x16xf32> to vector<16xf32>
    %235 = vector.shape_cast %234 : vector<16xf32> to vector<16x1xf32>
    %236 = vector.broadcast %235 : vector<16x1xf32> to vector<16x16xf32>
    %237 = arith.subf %233, %236 : vector<16x16xf32>
    %238 = math.exp %237 : vector<16x16xf32>
    %cst_95 = arith.constant dense<0.000000e+00> : vector<16xf32>
    %239 = vector.multi_reduction <add>, %238, %cst_95 [1] : vector<16x16xf32> to vector<16xf32>
    %240 = vector.shape_cast %239 : vector<16xf32> to vector<16x1xf32>
    %241 = tpu.reciprocal %240 {approx = true} : vector<16x1xf32> -> vector<16x1xf32>
    %242 = vector.broadcast %241 : vector<16x1xf32> to vector<16x16xf32>
    %243 = arith.mulf %238, %242 : vector<16x16xf32>
    %cst_96 = arith.constant dense<0.000000e+00> : vector<16x8xf32>
    %244 = tpu.matmul %243, %229, %cst_96 {dimension_numbers = #tpu.dot_dimension_numbers<[1], [0], [0], [1], [0, 0, 1, 1], [], []>} : vector<16x16xf32>, vector<16x8xf32>, vector<16x8xf32> -> vector<16x8xf32>
    %245 = vector.extract_strided_slice %208 {offsets = [0, 16], sizes = [16, 8], strides = [1, 1]} : vector<16x128xf32> to vector<16x8xf32>
    %246 = vector.extract_strided_slice %208 {offsets = [0, 48], sizes = [16, 8], strides = [1, 1]} : vector<16x128xf32> to vector<16x8xf32>
    %247 = vector.extract_strided_slice %208 {offsets = [0, 80], sizes = [16, 8], strides = [1, 1]} : vector<16x128xf32> to vector<16x8xf32>
    %cst_97 = arith.constant dense<0.000000e+00> : vector<16x16xf32>
    %248 = tpu.matmul %245, %246, %cst_97 {dimension_numbers = #tpu.dot_dimension_numbers<[1], [1], [0], [0], [0, 0, 1, 0], [], []>} : vector<16x8xf32>, vector<16x8xf32>, vector<16x16xf32> -> vector<16x16xf32>
    %249 = vector.broadcast %29 : f32 to vector<16x16xf32>
    %250 = arith.mulf %248, %249 : vector<16x16xf32>
    %251 = arith.addf %250, %27 : vector<16x16xf32>
    %cst_98 = arith.constant dense<0xFF800000> : vector<16xf32>
    %252 = vector.multi_reduction <maximumf>, %251, %cst_98 [1] : vector<16x16xf32> to vector<16xf32>
    %253 = vector.shape_cast %252 : vector<16xf32> to vector<16x1xf32>
    %254 = vector.broadcast %253 : vector<16x1xf32> to vector<16x16xf32>
    %255 = arith.subf %251, %254 : vector<16x16xf32>
    %256 = math.exp %255 : vector<16x16xf32>
    %cst_99 = arith.constant dense<0.000000e+00> : vector<16xf32>
    %257 = vector.multi_reduction <add>, %256, %cst_99 [1] : vector<16x16xf32> to vector<16xf32>
    %258 = vector.shape_cast %257 : vector<16xf32> to vector<16x1xf32>
    %259 = tpu.reciprocal %258 {approx = true} : vector<16x1xf32> -> vector<16x1xf32>
    %260 = vector.broadcast %259 : vector<16x1xf32> to vector<16x16xf32>
    %261 = arith.mulf %256, %260 : vector<16x16xf32>
    %cst_100 = arith.constant dense<0.000000e+00> : vector<16x8xf32>
    %262 = tpu.matmul %261, %247, %cst_100 {dimension_numbers = #tpu.dot_dimension_numbers<[1], [0], [0], [1], [0, 0, 1, 1], [], []>} : vector<16x16xf32>, vector<16x8xf32>, vector<16x8xf32> -> vector<16x8xf32>
    %263 = vector.extract_strided_slice %208 {offsets = [0, 24], sizes = [16, 8], strides = [1, 1]} : vector<16x128xf32> to vector<16x8xf32>
    %264 = vector.extract_strided_slice %208 {offsets = [0, 56], sizes = [16, 8], strides = [1, 1]} : vector<16x128xf32> to vector<16x8xf32>
    %265 = vector.extract_strided_slice %208 {offsets = [0, 88], sizes = [16, 8], strides = [1, 1]} : vector<16x128xf32> to vector<16x8xf32>
    %cst_101 = arith.constant dense<0.000000e+00> : vector<16x16xf32>
    %266 = tpu.matmul %263, %264, %cst_101 {dimension_numbers = #tpu.dot_dimension_numbers<[1], [1], [0], [0], [0, 0, 1, 0], [], []>} : vector<16x8xf32>, vector<16x8xf32>, vector<16x16xf32> -> vector<16x16xf32>
    %267 = vector.broadcast %29 : f32 to vector<16x16xf32>
    %268 = arith.mulf %266, %267 : vector<16x16xf32>
    %269 = arith.addf %268, %27 : vector<16x16xf32>
    %cst_102 = arith.constant dense<0xFF800000> : vector<16xf32>
    %270 = vector.multi_reduction <maximumf>, %269, %cst_102 [1] : vector<16x16xf32> to vector<16xf32>
    %271 = vector.shape_cast %270 : vector<16xf32> to vector<16x1xf32>
    %272 = vector.broadcast %271 : vector<16x1xf32> to vector<16x16xf32>
    %273 = arith.subf %269, %272 : vector<16x16xf32>
    %274 = math.exp %273 : vector<16x16xf32>
    %cst_103 = arith.constant dense<0.000000e+00> : vector<16xf32>
    %275 = vector.multi_reduction <add>, %274, %cst_103 [1] : vector<16x16xf32> to vector<16xf32>
    %276 = vector.shape_cast %275 : vector<16xf32> to vector<16x1xf32>
    %277 = tpu.reciprocal %276 {approx = true} : vector<16x1xf32> -> vector<16x1xf32>
    %278 = vector.broadcast %277 : vector<16x1xf32> to vector<16x16xf32>
    %279 = arith.mulf %274, %278 : vector<16x16xf32>
    %cst_104 = arith.constant dense<0.000000e+00> : vector<16x8xf32>
    %280 = tpu.matmul %279, %265, %cst_104 {dimension_numbers = #tpu.dot_dimension_numbers<[1], [0], [0], [1], [0, 0, 1, 1], [], []>} : vector<16x16xf32>, vector<16x8xf32>, vector<16x8xf32> -> vector<16x8xf32>
    %281 = tpu.concatenate %226, %244, %262, %280 in 1 : vector<16x8xf32>, vector<16x8xf32>, vector<16x8xf32>, vector<16x8xf32> -> vector<16x32xf32>
    %c1_105 = arith.constant 1 : index
    %c0_106 = arith.constant 0 : index
    %c0_107 = arith.constant 0 : index
    %282 = vector.load %arg7[%c1_105, %c0_106, %c0_107] : memref<2x32x32xf32, #tpu.memory_space<vmem>>, vector<1x32x32xf32>
    %283 = vector.shape_cast %282 : vector<1x32x32xf32> to vector<32x32xf32>
    %cst_108 = arith.constant dense<0.000000e+00> : vector<16x32xf32>
    %284 = tpu.matmul %281, %283, %cst_108 {dimension_numbers = #tpu.dot_dimension_numbers<[1], [0], [0], [1], [0, 0, 1, 1], [], []>} : vector<16x32xf32>, vector<32x32xf32>, vector<16x32xf32> -> vector<16x32xf32>
    %c1_109 = arith.constant 1 : index
    %c0_110 = arith.constant 0 : index
    %c0_111 = arith.constant 0 : index
    %285 = vector.load %arg8[%c1_109, %c0_110, %c0_111] : memref<2x1x32xf32, #tpu.memory_space<vmem>>, vector<1x1x32xf32>
    %286 = vector.shape_cast %285 : vector<1x1x32xf32> to vector<1x32xf32>
    %287 = vector.broadcast %286 : vector<1x32xf32> to vector<16x32xf32>
    %288 = arith.addf %284, %287 : vector<16x32xf32>
    %289 = arith.addf %288, %201 : vector<16x32xf32>
    %c1_112 = arith.constant 1 : index
    %c0_113 = arith.constant 0 : index
    %c0_114 = arith.constant 0 : index
    %290 = vector.load %arg9[%c1_112, %c0_113, %c0_114] : memref<2x1x32xf32, #tpu.memory_space<vmem>>, vector<1x1x32xf32>
    %291 = vector.shape_cast %290 : vector<1x1x32xf32> to vector<1x32xf32>
    %c1_115 = arith.constant 1 : index
    %c0_116 = arith.constant 0 : index
    %c0_117 = arith.constant 0 : index
    %292 = vector.load %arg10[%c1_115, %c0_116, %c0_117] : memref<2x1x32xf32, #tpu.memory_space<vmem>>, vector<1x1x32xf32>
    %293 = vector.shape_cast %292 : vector<1x1x32xf32> to vector<1x32xf32>
    %cst_118 = arith.constant dense<0.000000e+00> : vector<16xf32>
    %294 = vector.multi_reduction <add>, %289, %cst_118 [1] : vector<16x32xf32> to vector<16xf32>
    %295 = vector.shape_cast %294 : vector<16xf32> to vector<16x1xf32>
    %cst_119 = arith.constant 3.200000e+01 : f32
    %296 = vector.broadcast %cst_119 : f32 to vector<16x1xf32>
    %297 = arith.divf %295, %296 : vector<16x1xf32>
    %298 = vector.broadcast %297 : vector<16x1xf32> to vector<16x32xf32>
    %299 = arith.subf %289, %298 : vector<16x32xf32>
    %300 = vector.broadcast %297 : vector<16x1xf32> to vector<16x32xf32>
    %301 = arith.subf %289, %300 : vector<16x32xf32>
    %302 = arith.mulf %299, %301 : vector<16x32xf32>
    %cst_120 = arith.constant dense<0.000000e+00> : vector<16xf32>
    %303 = vector.multi_reduction <add>, %302, %cst_120 [1] : vector<16x32xf32> to vector<16xf32>
    %304 = vector.shape_cast %303 : vector<16xf32> to vector<16x1xf32>
    %cst_121 = arith.constant 3.200000e+01 : f32
    %305 = vector.broadcast %cst_121 : f32 to vector<16x1xf32>
    %306 = arith.divf %304, %305 : vector<16x1xf32>
    %307 = vector.broadcast %297 : vector<16x1xf32> to vector<16x32xf32>
    %308 = arith.subf %289, %307 : vector<16x32xf32>
    %cst_122 = arith.constant 9.99999996E-13 : f32
    %309 = vector.broadcast %cst_122 : f32 to vector<16x1xf32>
    %310 = arith.addf %306, %309 : vector<16x1xf32>
    %311 = math.rsqrt %310 : vector<16x1xf32>
    %312 = vector.broadcast %311 : vector<16x1xf32> to vector<16x32xf32>
    %313 = arith.mulf %308, %312 : vector<16x32xf32>
    %314 = vector.broadcast %291 : vector<1x32xf32> to vector<16x32xf32>
    %315 = arith.mulf %313, %314 : vector<16x32xf32>
    %316 = vector.broadcast %293 : vector<1x32xf32> to vector<16x32xf32>
    %317 = arith.addf %315, %316 : vector<16x32xf32>
    %c1_123 = arith.constant 1 : index
    %c0_124 = arith.constant 0 : index
    %c0_125 = arith.constant 0 : index
    %318 = vector.load %arg11[%c1_123, %c0_124, %c0_125] : memref<2x32x64xf32, #tpu.memory_space<vmem>>, vector<1x32x64xf32>
    %319 = vector.shape_cast %318 : vector<1x32x64xf32> to vector<32x64xf32>
    %cst_126 = arith.constant dense<0.000000e+00> : vector<16x64xf32>
    %320 = tpu.matmul %317, %319, %cst_126 {dimension_numbers = #tpu.dot_dimension_numbers<[1], [0], [0], [1], [0, 0, 1, 1], [], []>} : vector<16x32xf32>, vector<32x64xf32>, vector<16x64xf32> -> vector<16x64xf32>
    %c1_127 = arith.constant 1 : index
    %c0_128 = arith.constant 0 : index
    %c0_129 = arith.constant 0 : index
    %321 = vector.load %arg12[%c1_127, %c0_128, %c0_129] : memref<2x1x64xf32, #tpu.memory_space<vmem>>, vector<1x1x64xf32>
    %322 = vector.shape_cast %321 : vector<1x1x64xf32> to vector<1x64xf32>
    %323 = vector.broadcast %322 : vector<1x64xf32> to vector<16x64xf32>
    %324 = arith.addf %320, %323 : vector<16x64xf32>
    %cst_130 = arith.constant 5.000000e-01 : f32
    %325 = vector.broadcast %cst_130 : f32 to vector<16x64xf32>
    %326 = arith.mulf %325, %324 : vector<16x64xf32>
    %cst_131 = arith.constant 4.471500e-02 : f32
    %327 = vector.broadcast %cst_131 : f32 to vector<16x64xf32>
    %328 = arith.mulf %327, %324 : vector<16x64xf32>
    %329 = arith.mulf %328, %324 : vector<16x64xf32>
    %330 = arith.mulf %329, %324 : vector<16x64xf32>
    %331 = arith.addf %324, %330 : vector<16x64xf32>
    %cst_132 = arith.constant 0.797884583 : f32
    %332 = vector.broadcast %cst_132 : f32 to vector<16x64xf32>
    %333 = arith.mulf %332, %331 : vector<16x64xf32>
    %334 = math.tanh %333 : vector<16x64xf32>
    %cst_133 = arith.constant 1.000000e+00 : f32
    %335 = vector.broadcast %cst_133 : f32 to vector<16x64xf32>
    %336 = arith.addf %335, %334 : vector<16x64xf32>
    %337 = arith.mulf %326, %336 : vector<16x64xf32>
    %c1_134 = arith.constant 1 : index
    %c0_135 = arith.constant 0 : index
    %c0_136 = arith.constant 0 : index
    %338 = vector.load %arg13[%c1_134, %c0_135, %c0_136] : memref<2x64x32xf32, #tpu.memory_space<vmem>>, vector<1x64x32xf32>
    %339 = vector.shape_cast %338 : vector<1x64x32xf32> to vector<64x32xf32>
    %cst_137 = arith.constant dense<0.000000e+00> : vector<16x32xf32>
    %340 = tpu.matmul %337, %339, %cst_137 {dimension_numbers = #tpu.dot_dimension_numbers<[1], [0], [0], [1], [0, 0, 1, 1], [], []>} : vector<16x64xf32>, vector<64x32xf32>, vector<16x32xf32> -> vector<16x32xf32>
    %c1_138 = arith.constant 1 : index
    %c0_139 = arith.constant 0 : index
    %c0_140 = arith.constant 0 : index
    %341 = vector.load %arg14[%c1_138, %c0_139, %c0_140] : memref<2x1x32xf32, #tpu.memory_space<vmem>>, vector<1x1x32xf32>
    %342 = vector.shape_cast %341 : vector<1x1x32xf32> to vector<1x32xf32>
    %343 = vector.broadcast %342 : vector<1x32xf32> to vector<16x32xf32>
    %344 = arith.addf %340, %343 : vector<16x32xf32>
    %345 = arith.addf %344, %317 : vector<16x32xf32>
    %c1_141 = arith.constant 1 : index
    %c0_142 = arith.constant 0 : index
    %c0_143 = arith.constant 0 : index
    %346 = vector.load %arg15[%c1_141, %c0_142, %c0_143] : memref<2x1x32xf32, #tpu.memory_space<vmem>>, vector<1x1x32xf32>
    %347 = vector.shape_cast %346 : vector<1x1x32xf32> to vector<1x32xf32>
    %c1_144 = arith.constant 1 : index
    %c0_145 = arith.constant 0 : index
    %c0_146 = arith.constant 0 : index
    %348 = vector.load %arg16[%c1_144, %c0_145, %c0_146] : memref<2x1x32xf32, #tpu.memory_space<vmem>>, vector<1x1x32xf32>
    %349 = vector.shape_cast %348 : vector<1x1x32xf32> to vector<1x32xf32>
    %cst_147 = arith.constant dense<0.000000e+00> : vector<16xf32>
    %350 = vector.multi_reduction <add>, %345, %cst_147 [1] : vector<16x32xf32> to vector<16xf32>
    %351 = vector.shape_cast %350 : vector<16xf32> to vector<16x1xf32>
    %cst_148 = arith.constant 3.200000e+01 : f32
    %352 = vector.broadcast %cst_148 : f32 to vector<16x1xf32>
    %353 = arith.divf %351, %352 : vector<16x1xf32>
    %354 = vector.broadcast %353 : vector<16x1xf32> to vector<16x32xf32>
    %355 = arith.subf %345, %354 : vector<16x32xf32>
    %356 = vector.broadcast %353 : vector<16x1xf32> to vector<16x32xf32>
    %357 = arith.subf %345, %356 : vector<16x32xf32>
    %358 = arith.mulf %355, %357 : vector<16x32xf32>
    %cst_149 = arith.constant dense<0.000000e+00> : vector<16xf32>
    %359 = vector.multi_reduction <add>, %358, %cst_149 [1] : vector<16x32xf32> to vector<16xf32>
    %360 = vector.shape_cast %359 : vector<16xf32> to vector<16x1xf32>
    %cst_150 = arith.constant 3.200000e+01 : f32
    %361 = vector.broadcast %cst_150 : f32 to vector<16x1xf32>
    %362 = arith.divf %360, %361 : vector<16x1xf32>
    %363 = vector.broadcast %353 : vector<16x1xf32> to vector<16x32xf32>
    %364 = arith.subf %345, %363 : vector<16x32xf32>
    %cst_151 = arith.constant 9.99999996E-13 : f32
    %365 = vector.broadcast %cst_151 : f32 to vector<16x1xf32>
    %366 = arith.addf %362, %365 : vector<16x1xf32>
    %367 = math.rsqrt %366 : vector<16x1xf32>
    %368 = vector.broadcast %367 : vector<16x1xf32> to vector<16x32xf32>
    %369 = arith.mulf %364, %368 : vector<16x32xf32>
    %370 = vector.broadcast %347 : vector<1x32xf32> to vector<16x32xf32>
    %371 = arith.mulf %369, %370 : vector<16x32xf32>
    %372 = vector.broadcast %349 : vector<1x32xf32> to vector<16x32xf32>
    %373 = arith.addf %371, %372 : vector<16x32xf32>
    %374 = vector.extract_strided_slice %373 {offsets = [0, 0], sizes = [1, 32], strides = [1, 1]} : vector<16x32xf32> to vector<1x32xf32>
    %375 = vector.extract_strided_slice %373 {offsets = [8, 0], sizes = [1, 32], strides = [1, 1]} : vector<16x32xf32> to vector<1x32xf32>
    %376 = tpu.concatenate %374, %375 in 0 : vector<1x32xf32>, vector<1x32xf32> -> vector<2x32xf32>
    %c0_152 = arith.constant 0 : index
    %c0_153 = arith.constant 0 : index
    %377 = vector.load %arg17[%c0_152, %c0_153] : memref<32x32xf32, #tpu.memory_space<vmem>>, vector<32x32xf32>
    %cst_154 = arith.constant dense<0.000000e+00> : vector<2x32xf32>
    %378 = tpu.matmul %376, %377, %cst_154 {dimension_numbers = #tpu.dot_dimension_numbers<[1], [0], [0], [1], [0, 0, 1, 1], [], []>} : vector<2x32xf32>, vector<32x32xf32>, vector<2x32xf32> -> vector<2x32xf32>
    %c0_155 = arith.constant 0 : index
    %c0_156 = arith.constant 0 : index
    %379 = vector.load %arg18[%c0_155, %c0_156] : memref<1x32xf32, #tpu.memory_space<vmem>>, vector<1x32xf32>
    %380 = vector.broadcast %379 : vector<1x32xf32> to vector<2x32xf32>
    %381 = arith.addf %378, %380 : vector<2x32xf32>
    %382 = math.tanh %381 : vector<2x32xf32>
    %c0_157 = arith.constant 0 : index
    %c0_158 = arith.constant 0 : index
    %383 = vector.load %arg19[%c0_157, %c0_158] : memref<32x128xf32, #tpu.memory_space<vmem>>, vector<32x128xf32>
    %cst_159 = arith.constant dense<0.000000e+00> : vector<2x128xf32>
    %384 = tpu.matmul %382, %383, %cst_159 {dimension_numbers = #tpu.dot_dimension_numbers<[1], [0], [0], [1], [0, 0, 1, 1], [], []>} : vector<2x32xf32>, vector<32x128xf32>, vector<2x128xf32> -> vector<2x128xf32>
    %c0_160 = arith.constant 0 : index
    %c0_161 = arith.constant 0 : index
    %385 = vector.load %arg20[%c0_160, %c0_161] : memref<1x128xf32, #tpu.memory_space<vmem>>, vector<1x128xf32>
    %386 = vector.broadcast %385 : vector<1x128xf32> to vector<2x128xf32>
    %387 = arith.addf %384, %386 : vector<2x128xf32>
    %c0_162 = arith.constant 0 : index
    %c0_163 = arith.constant 0 : index
    %388 = vector.load %arg21[%c0_162, %c0_163] : memref<2x128xf32, #tpu.memory_space<vmem>>, vector<2x128xf32>
    tpu.vector_store %arg21[%c0_162, %c0_163], %387 {strides = array<i32>} : memref<2x128xf32, #tpu.memory_space<vmem>>, vector<2x128xf32>,
    return
  }
  func.func @transform_0(%arg0: i32) -> (i32, i32) {
    %c0_i32 = arith.constant 0 : i32
    %c0_i32_0 = arith.constant 0 : i32
    %c0_i32_1 = arith.constant 0 : i32
    return %c0_i32, %c0_i32_0 : i32, i32
  }
  func.func @transform_1(%arg0: i32) -> (i32, i32) {
    %c0_i32 = arith.constant 0 : i32
    %c0_i32_0 = arith.constant 0 : i32
    %c0_i32_1 = arith.constant 0 : i32
    return %c0_i32, %c0_i32_0 : i32, i32
  }
  func.func @transform_2(%arg0: i32) -> (i32, i32) {
    %c0_i32 = arith.constant 0 : i32
    %c0_i32_0 = arith.constant 0 : i32
    %c0_i32_1 = arith.constant 0 : i32
    return %c0_i32, %c0_i32_0 : i32, i32
  }
  func.func @transform_3(%arg0: i32) -> (i32, i32) {
    %c0_i32 = arith.constant 0 : i32
    %c0_i32_0 = arith.constant 0 : i32
    %c0_i32_1 = arith.constant 0 : i32
    return %c0_i32, %c0_i32_0 : i32, i32
  }
  func.func @transform_4(%arg0: i32) -> (i32, i32, i32) {
    %c0_i32 = arith.constant 0 : i32
    %c0_i32_0 = arith.constant 0 : i32
    %c0_i32_1 = arith.constant 0 : i32
    %c0_i32_2 = arith.constant 0 : i32
    return %c0_i32, %c0_i32_0, %c0_i32_1 : i32, i32, i32
  }
  func.func @transform_5(%arg0: i32) -> (i32, i32, i32) {
    %c0_i32 = arith.constant 0 : i32
    %c0_i32_0 = arith.constant 0 : i32
    %c0_i32_1 = arith.constant 0 : i32
    %c0_i32_2 = arith.constant 0 : i32
    return %c0_i32, %c0_i32_0, %c0_i32_1 : i32, i32, i32
  }
  func.func @transform_6(%arg0: i32) -> (i32, i32, i32) {
    %c0_i32 = arith.constant 0 : i32
    %c0_i32_0 = arith.constant 0 : i32
    %c0_i32_1 = arith.constant 0 : i32
    %c0_i32_2 = arith.constant 0 : i32
    return %c0_i32, %c0_i32_0, %c0_i32_1 : i32, i32, i32
  }
  func.func @transform_7(%arg0: i32) -> (i32, i32, i32) {
    %c0_i32 = arith.constant 0 : i32
    %c0_i32_0 = arith.constant 0 : i32
    %c0_i32_1 = arith.constant 0 : i32
    %c0_i32_2 = arith.constant 0 : i32
    return %c0_i32, %c0_i32_0, %c0_i32_1 : i32, i32, i32
  }
  func.func @transform_8(%arg0: i32) -> (i32, i32, i32) {
    %c0_i32 = arith.constant 0 : i32
    %c0_i32_0 = arith.constant 0 : i32
    %c0_i32_1 = arith.constant 0 : i32
    %c0_i32_2 = arith.constant 0 : i32
    return %c0_i32, %c0_i32_0, %c0_i32_1 : i32, i32, i32
  }
  func.func @transform_9(%arg0: i32) -> (i32, i32, i32) {
    %c0_i32 = arith.constant 0 : i32
    %c0_i32_0 = arith.constant 0 : i32
    %c0_i32_1 = arith.constant 0 : i32
    %c0_i32_2 = arith.constant 0 : i32
    return %c0_i32, %c0_i32_0, %c0_i32_1 : i32, i32, i32
  }
  func.func @transform_10(%arg0: i32) -> (i32, i32, i32) {
    %c0_i32 = arith.constant 0 : i32
    %c0_i32_0 = arith.constant 0 : i32
    %c0_i32_1 = arith.constant 0 : i32
    %c0_i32_2 = arith.constant 0 : i32
    return %c0_i32, %c0_i32_0, %c0_i32_1 : i32, i32, i32
  }
  func.func @transform_11(%arg0: i32) -> (i32, i32, i32) {
    %c0_i32 = arith.constant 0 : i32
    %c0_i32_0 = arith.constant 0 : i32
    %c0_i32_1 = arith.constant 0 : i32
    %c0_i32_2 = arith.constant 0 : i32
    return %c0_i32, %c0_i32_0, %c0_i32_1 : i32, i32, i32
  }
  func.func @transform_12(%arg0: i32) -> (i32, i32, i32) {
    %c0_i32 = arith.constant 0 : i32
    %c0_i32_0 = arith.constant 0 : i32
    %c0_i32_1 = arith.constant 0 : i32
    %c0_i32_2 = arith.constant 0 : i32
    return %c0_i32, %c0_i32_0, %c0_i32_1 : i32, i32, i32
  }
  func.func @transform_13(%arg0: i32) -> (i32, i32, i32) {
    %c0_i32 = arith.constant 0 : i32
    %c0_i32_0 = arith.constant 0 : i32
    %c0_i32_1 = arith.constant 0 : i32
    %c0_i32_2 = arith.constant 0 : i32
    return %c0_i32, %c0_i32_0, %c0_i32_1 : i32, i32, i32
  }
  func.func @transform_14(%arg0: i32) -> (i32, i32, i32) {
    %c0_i32 = arith.constant 0 : i32
    %c0_i32_0 = arith.constant 0 : i32
    %c0_i32_1 = arith.constant 0 : i32
    %c0_i32_2 = arith.constant 0 : i32
    return %c0_i32, %c0_i32_0, %c0_i32_1 : i32, i32, i32
  }
  func.func @transform_15(%arg0: i32) -> (i32, i32, i32) {
    %c0_i32 = arith.constant 0 : i32
    %c0_i32_0 = arith.constant 0 : i32
    %c0_i32_1 = arith.constant 0 : i32
    %c0_i32_2 = arith.constant 0 : i32
    return %c0_i32, %c0_i32_0, %c0_i32_1 : i32, i32, i32
  }
  func.func @transform_16(%arg0: i32) -> (i32, i32) {
    %c0_i32 = arith.constant 0 : i32
    %c0_i32_0 = arith.constant 0 : i32
    %c0_i32_1 = arith.constant 0 : i32
    return %c0_i32, %c0_i32_0 : i32, i32
  }
  func.func @transform_17(%arg0: i32) -> (i32, i32) {
    %c0_i32 = arith.constant 0 : i32
    %c0_i32_0 = arith.constant 0 : i32
    %c0_i32_1 = arith.constant 0 : i32
    return %c0_i32, %c0_i32_0 : i32, i32
  }
  func.func @transform_18(%arg0: i32) -> (i32, i32) {
    %c0_i32 = arith.constant 0 : i32
    %c0_i32_0 = arith.constant 0 : i32
    %c0_i32_1 = arith.constant 0 : i32
    return %c0_i32, %c0_i32_0 : i32, i32
  }
  func.func @transform_19(%arg0: i32) -> (i32, i32) {
    %c0_i32 = arith.constant 0 : i32
    %c0_i32_0 = arith.constant 0 : i32
    %c0_i32_1 = arith.constant 0 : i32
    return %c0_i32, %c0_i32_0 : i32, i32
  }
  func.func @transform_20(%arg0: i32) -> (i32, i32) {
    %c0_i32 = arith.constant 0 : i32
    %c0_i32_0 = arith.constant 0 : i32
    %c0_i32_1 = arith.constant 0 : i32
    return %c0_i32, %c0_i32_0 : i32, i32
  }
}

</mosaic_0001>

<bundles_post_ra>
// kernel: tpu_custom_call.1
= control target key start
LH: loop header
LB: loop body
LE: loop exit
PB: predicated region body
PF: predicated region fallthrough
CT: control target
= control target key end

     0   :  { %s5146_s0 = inlined_call_operand.hbm [shape: f32[16,32], index: 0, kind: input, shape index: {}]   ;;  %s5147_s1 = inlined_call_operand.hbm [shape: f32[16,16], index: 1, kind: input, shape index: {}]   ;;  %s5148_s2 = inlined_call_operand.hbm [shape: f32[1,32], index: 2, kind: input, shape index: {}]   ;;  %s5149_s3 = inlined_call_operand.hbm [shape: f32[1,32], index: 3, kind: input, shape index: {}]   ;;  %s5150_s4 = inlined_call_operand.vmem [shape: f32[2,32,128], index: 4, kind: input, shape index: {}]   ;;  %s5151_s5 = inlined_call_operand.hbm [shape: f32[2,1,128], index: 5, kind: input, shape index: {}]   ;;  %s5152_s6 = inlined_call_operand.vmem [shape: f32[2,32,32], index: 6, kind: input, shape index: {}]   ;;  %s5153_s7 = inlined_call_operand.hbm [shape: f32[2,1,32], index: 7, kind: input, shape index: {}]   ;;  %s5154_s8 = inlined_call_operand.hbm [shape: f32[2,1,32], index: 8, kind: input, shape index: {}]   ;;  %s5155_s9 = inlined_call_operand.hbm [shape: f32[2,1,32], index: 9, kind: input, shape index: {}]   ;;  %s5156_s10 = inlined_call_operand.vmem [shape: f32[2,32,64], index: 10, kind: input, shape index: {}]   ;;  %s5157_s11 = inlined_call_operand.hbm [shape: f32[2,1,64], index: 11, kind: input, shape index: {}]   ;;  %s5158_s12 = inlined_call_operand.vmem [shape: f32[2,64,32], index: 12, kind: input, shape index: {}]   ;;  %s5159_s13 = inlined_call_operand.hbm [shape: f32[2,1,32], index: 13, kind: input, shape index: {}]   ;;  %s5160_s14 = inlined_call_operand.hbm [shape: f32[2,1,32], index: 14, kind: input, shape index: {}]   ;;  %s5161_s15 = inlined_call_operand.hbm [shape: f32[2,1,32], index: 15, kind: input, shape index: {}]   ;;  %s5162_s16 = inlined_call_operand.vmem [shape: f32[32,32], index: 16, kind: input, shape index: {}]   ;;  %s5163_s17 = inlined_call_operand.hbm [shape: f32[1,32], index: 17, kind: input, shape index: {}]   ;;  %s5164_s18 = inlined_call_operand.vmem [shape: f32[32,128], index: 18, kind: input, shape index: {}]   ;;  %s5165_s19 = inlined_call_operand.vmem [shape: f32[1,128], index: 19, kind: input, shape index: {}]   ;;  %s5166_s20 = inlined_call_operand.hbm [shape: f32[2,128], index: 20, kind: output, shape index: {}]  }
   0x1   :  { %5177 = sst [smem:[#allocation32_spill]] %s5146_s0 }
   0x2   :  { %5178 = sst [smem:[#allocation33_spill]] %s5147_s1 }
   0x3   :  { %5179 = sst [smem:[#allocation34_spill]] %s5148_s2 }
   0x4   :  { %5180 = sst [smem:[#allocation35_spill]] %s5149_s3 }
   0x5   :  { %5181 = sst [smem:[#allocation36_spill]] %s5150_s4 }
   0x6   :  { %25 = vsyncpa [#allocation3], 0 }
   0x7   :  { %26 = vsyncpa [#allocation6], 0 }
   0x8   :  { %27 = vsyncpa [#allocation9], 0 }
   0x9   :  { %28 = vsyncpa [#allocation12], 0 }
   0xa   :  { %29 = vsyncpa [#allocation15], 0 }
   0xb   :  { %30 = vsyncpa [#allocation18], 0 }
   0xc   :  { %31 = vsyncpa [#allocation21], 0 }
   0xd   :  { %32 = vsyncpa [#allocation4], 0  ;;  %s4329_s1 = smov [#allocation5]   ;;  %s4330_s23 = smov [#allocation8]  }
   0xe   :  { %s50_s22 = sshll.u32 %s4329_s1, 4  ;;  %s73_s24 = sshll.u32 %s4330_s23, 4  ;;  %s51_s22 = int_to_ptr.vmem [resolvable:$true] %s50_s22  ;;  %s4467_s24 = int_to_ptr.vmem [resolvable:$true] %s73_s24 }
   0xf   :  { %s5182_s3 = sld [smem:[#allocation33_spill]] }
  0x15   :  { %s4005_s26 = scalar_lea.hbm %s5182_s3, 256 }
  0x16   :  { %p4006_p0 = scmp.ne.s32.totalorder %s5182_s3, %s4005_s26  ;;  %p4009_p1 = scmp.lt.u32.totalorder %s4005_s26, %s5182_s3 }
  0x18   :  { %p4011_p2 = pnand %p4009_p1, %p4006_p0 }
  0x1a   :  { %4014 = shalt.err (!%p4011_p2)
}
  0x1b   :  { %s4015_s30 = scalar_lea.vmem %s51_s22, 256  ;;  %p4020_p4 = scmp.lt.s32.totalorder %s51_s22, %s51_s22 }
  0x1c   :  { %p4016_p3 = scmp.ne.s32.totalorder %s51_s22, %s4015_s30  ;;  %p4021_p5 = scmp.lt.s32.totalorder %s4015_s30, %s4015_s30 }
  0x1e   :  { %p4022_p6 = por %p4021_p5, %p4020_p4 }
  0x20   :  { %p4023_p7 = pnand %p4022_p6, %p4016_p3 }
  0x22   :  { %4026 = shalt.err (!%p4023_p7)
}
  0x23   :  { %s5172_s0 = smov 128   ;;  %s5173_s21 = smov 8  }
  0x24   :  { %56 = dma.hbm_to_vmem [thread:$0]  %s5182_s3, 256, %s51_s22, [#allocation6], %s5172_s0, %s5172_s0, %s5173_s21  }
  0x25   :  { %s5183_s26 = sld [smem:[#allocation35_spill]] }
  0x2b   :  { %s4027_s27 = scalar_lea.hbm %s5183_s26, 16 }
  0x2c   :  { %p4028_p8 = scmp.ne.s32.totalorder %s5183_s26, %s4027_s27  ;;  %p4031_p9 = scmp.lt.u32.totalorder %s4027_s27, %s5183_s26 }
  0x2e   :  { %p4033_p10 = pnand %p4031_p9, %p4028_p8 }
  0x30   :  { %4036 = shalt.err (!%p4033_p10)
}
  0x31   :  { %s4037_s1 = scalar_lea.vmem %s4467_s24, 16  ;;  %s4041_s22 = scalar_lea.vmem %s4467_s24, 32 }
  0x32   :  { %p4038_p11 = scmp.ne.s32.totalorder %s4467_s24, %s4037_s1  ;;  %p4042_p12 = scmp.lt.s32.totalorder %s4467_s24, %s4467_s24 }
  0x33   :  { %p4043_p13 = scmp.lt.s32.totalorder %s4041_s22, %s4037_s1 }
  0x35   :  { %p4044_p0 = por %p4043_p13, %p4042_p12 }
  0x37   :  { %p4045_p1 = pnand %p4044_p0, %p4038_p11 }
  0x39   :  { %4048 = shalt.err (!%p4045_p1)
}
  0x3a   :  { %76 = dma.hbm_to_vmem [thread:$0]  %s5183_s26, 16, %s4467_s24, [#allocation9]  }
  0x3b   :  { %s4333_s2 = smov [#allocation11]   ;;  %s4334_s27 = smov [#allocation14]  }
  0x3c   :  { %s98_s25 = sshll.u32 %s4333_s2, 4  ;;  %s122_s28 = sshll.u32 %s4334_s27, 4  ;;  %s99_s25 = int_to_ptr.vmem [resolvable:$true] %s98_s25  ;;  %s4502_s28 = int_to_ptr.vmem [resolvable:$true] %s122_s28 }
  0x3d   :  { %s4049_s30 = scalar_lea.hbm %s5153_s7, 32 }
  0x3e   :  { %p4050_p2 = scmp.ne.s32.totalorder %s5153_s7, %s4049_s30  ;;  %p4053_p3 = scmp.lt.u32.totalorder %s4049_s30, %s5153_s7 }
  0x40   :  { %p4055_p4 = pnand %p4053_p3, %p4050_p2 }
  0x42   :  { %4058 = shalt.err (!%p4055_p4)
}
  0x43   :  { %s4059_s24 = scalar_lea.vmem %s99_s25, 32  ;;  %p4064_p6 = scmp.lt.s32.totalorder %s99_s25, %s99_s25 }
  0x44   :  { %p4060_p5 = scmp.ne.s32.totalorder %s99_s25, %s4059_s24  ;;  %p4065_p7 = scmp.lt.s32.totalorder %s4059_s24, %s4059_s24 }
  0x46   :  { %p4066_p8 = por %p4065_p7, %p4064_p6 }
  0x48   :  { %p4067_p9 = pnand %p4066_p8, %p4060_p5 }
  0x4a   :  { %4070 = shalt.err (!%p4067_p9)
}
  0x4b   :  { %s4335_s26 = smov 16   ;;  %s4336_s3 = smov 1  }
  0x4c   :  { %104 = dma.hbm_to_vmem [thread:$0]  %s5153_s7, 32, %s99_s25, [#allocation12], %s4335_s26, %s4335_s26, %s4336_s3  }
  0x4d   :  { %s4071_s27 = scalar_lea.hbm %s5155_s9, 32 }
  0x4e   :  { %p4072_p10 = scmp.ne.s32.totalorder %s5155_s9, %s4071_s27  ;;  %p4075_p11 = scmp.lt.u32.totalorder %s4071_s27, %s5155_s9 }
  0x50   :  { %p4077_p12 = pnand %p4075_p11, %p4072_p10 }
  0x52   :  { %4080 = shalt.err (!%p4077_p12)
}
  0x53   :  { %s4081_s22 = scalar_lea.vmem %s4502_s28, 32  ;;  %p4086_p0 = scmp.lt.s32.totalorder %s4502_s28, %s4502_s28 }
  0x54   :  { %p4082_p13 = scmp.ne.s32.totalorder %s4502_s28, %s4081_s22  ;;  %p4087_p1 = scmp.lt.s32.totalorder %s4081_s22, %s4081_s22 }
  0x56   :  { %p4088_p2 = por %p4087_p1, %p4086_p0 }
  0x58   :  { %p4089_p3 = pnand %p4088_p2, %p4082_p13 }
  0x5a   :  { %4092 = shalt.err (!%p4089_p3)
}
  0x5b   :  { %128 = dma.hbm_to_vmem [thread:$0]  %s5155_s9, 32, %s4502_s28, [#allocation15], %s4335_s26, %s4335_s26, %s4336_s3  }
  0x5c   :  { %s4337_s24 = smov [#allocation17]   ;;  %s4338_s2 = smov [#allocation20]  }
  0x5d   :  { %s150_s23 = sshll.u32 %s4337_s24, 4  ;;  %s174_s0 = sshll.u32 %s4338_s2, 4  ;;  %s151_s23 = int_to_ptr.vmem [resolvable:$true] %s150_s23  ;;  %s4539_s0 = int_to_ptr.vmem [resolvable:$true] %s174_s0 }
  0x5e   :  { %s4093_s4 = scalar_lea.hbm %s5159_s13, 32 }
  0x5f   :  { %p4094_p4 = scmp.ne.s32.totalorder %s5159_s13, %s4093_s4  ;;  %p4097_p5 = scmp.lt.u32.totalorder %s4093_s4, %s5159_s13 }
  0x61   :  { %p4099_p6 = pnand %p4097_p5, %p4094_p4 }
  0x63   :  { %4102 = shalt.err (!%p4099_p6)
}
  0x64   :  { %s4103_s9 = scalar_lea.vmem %s151_s23, 32  ;;  %p4108_p8 = scmp.lt.s32.totalorder %s151_s23, %s151_s23 }
  0x65   :  { %p4104_p7 = scmp.ne.s32.totalorder %s151_s23, %s4103_s9  ;;  %p4109_p9 = scmp.lt.s32.totalorder %s4103_s9, %s4103_s9 }
  0x67   :  { %p4110_p10 = por %p4109_p9, %p4108_p8 }
  0x69   :  { %p4111_p11 = pnand %p4110_p10, %p4104_p7 }
  0x6b   :  { %4114 = shalt.err (!%p4111_p11)
}
  0x6c   :  { %156 = dma.hbm_to_vmem [thread:$0]  %s5159_s13, 32, %s151_s23, [#allocation18], %s4335_s26, %s4335_s26, %s4336_s3  }
  0x6d   :  { %s4115_s2 = scalar_lea.hbm %s5161_s15, 32 }
  0x6e   :  { %p4116_p12 = scmp.ne.s32.totalorder %s5161_s15, %s4115_s2  ;;  %p4119_p13 = scmp.lt.u32.totalorder %s4115_s2, %s5161_s15 }
  0x70   :  { %p4121_p0 = pnand %p4119_p13, %p4116_p12 }
  0x72   :  { %4124 = shalt.err (!%p4121_p0)
}
  0x73   :  { %s4125_s30 = scalar_lea.vmem %s4539_s0, 32  ;;  %p4130_p2 = scmp.lt.s32.totalorder %s4539_s0, %s4539_s0 }
  0x74   :  { %p4126_p1 = scmp.ne.s32.totalorder %s4539_s0, %s4125_s30  ;;  %p4131_p3 = scmp.lt.s32.totalorder %s4125_s30, %s4125_s30 }
  0x76   :  { %p4132_p4 = por %p4131_p3, %p4130_p2 }
  0x78   :  { %p4133_p5 = pnand %p4132_p4, %p4126_p1 }
  0x7a   :  { %4136 = shalt.err (!%p4133_p5)
}
  0x7b   :  { %180 = dma.hbm_to_vmem [thread:$0]  %s5161_s15, 32, %s4539_s0, [#allocation21], %s4335_s26, %s4335_s26, %s4336_s3  }
  0x7c   :  { %s4339_s1 = smov [#allocation2]   ;;  %s4340_s9 = smov [#allocation7]  }
  0x7d   :  { %s38_s22 = sshll.u32 %s4339_s1, 4  ;;  %s63_s28 = sshll.u32 %s4340_s9, 4  ;;  %s39_s22 = int_to_ptr.vmem [resolvable:$true] %s38_s22  ;;  %s64_s28 = int_to_ptr.vmem [resolvable:$true] %s63_s28 }
  0x7e   :  { %s5184_s24 = sld [smem:[#allocation32_spill]] }
  0x84   :  { %s4137_s2 = scalar_lea.hbm %s5184_s24, 256 }
  0x85   :  { %p4138_p6 = scmp.ne.s32.totalorder %s5184_s24, %s4137_s2  ;;  %p4141_p7 = scmp.lt.u32.totalorder %s4137_s2, %s5184_s24 }
  0x87   :  { %p4143_p8 = pnand %p4141_p7, %p4138_p6 }
  0x89   :  { %4146 = shalt.err (!%p4143_p8)
}
  0x8a   :  { %s4147_s15 = scalar_lea.vmem %s39_s22, 256  ;;  %p4152_p10 = scmp.lt.s32.totalorder %s39_s22, %s39_s22 }
  0x8b   :  { %p4148_p9 = scmp.ne.s32.totalorder %s39_s22, %s4147_s15  ;;  %p4153_p11 = scmp.lt.s32.totalorder %s4147_s15, %s4147_s15 }
  0x8d   :  { %p4154_p12 = por %p4153_p11, %p4152_p10 }
  0x8f   :  { %p4155_p13 = pnand %p4154_p12, %p4148_p9 }
  0x91   :  { %4158 = shalt.err (!%p4155_p13)
}
  0x92   :  { %s5185_s0 = smov 8   ;;  %s5186_s30 = smov 128  }
  0x93   :  { %44 = dma.hbm_to_vmem [thread:$0]  %s5184_s24, 256, %s39_s22, [#allocation3], %s5186_s30, %s5186_s30, %s5185_s0  }
  0x94   :  { %s5187_s7 = sld [smem:[#allocation34_spill]] }
  0x9a   :  { %s4159_s25 = scalar_lea.hbm %s5187_s7, 16 }
  0x9b   :  { %p4160_p0 = scmp.ne.s32.totalorder %s5187_s7, %s4159_s25  ;;  %p4163_p1 = scmp.lt.u32.totalorder %s4159_s25, %s5187_s7 }
  0x9d   :  { %p4165_p2 = pnand %p4163_p1, %p4160_p0 }
  0x9f   :  { %4168 = shalt.err (!%p4165_p2)
}
  0xa0   :  { %s4169_s29 = scalar_lea.vmem %s64_s28, 16  ;;  %s4173_s15 = scalar_lea.vmem %s64_s28, 32 }
  0xa1   :  { %p4170_p3 = scmp.ne.s32.totalorder %s64_s28, %s4169_s29  ;;  %p4174_p4 = scmp.lt.s32.totalorder %s64_s28, %s64_s28 }
  0xa2   :  { %p4175_p5 = scmp.lt.s32.totalorder %s4173_s15, %s4169_s29 }
  0xa4   :  { %p4176_p6 = por %p4175_p5, %p4174_p4 }
  0xa6   :  { %p4177_p7 = pnand %p4176_p6, %p4170_p3 }
  0xa8   :  { %4180 = shalt.err (!%p4177_p7)
}
  0xa9   :  { %66 = dma.hbm_to_vmem [thread:$0]  %s5187_s7, 16, %s64_s28, [#allocation6]  }
  0xaa   :  { %s4341_s30 = smov [#allocation10]   ;;  %s4342_s23 = smov [#allocation13]  }
  0xab   :  { %s84_s13 = sshll.u32 %s4341_s30, 4  ;;  %s110_s1 = sshll.u32 %s4342_s23, 4  ;;  %s85_s13 = int_to_ptr.vmem [resolvable:$true] %s84_s13  ;;  %s4603_s1 = int_to_ptr.vmem [resolvable:$true] %s110_s1 }
  0xac   :  { %s4181_s2 = scalar_lea.hbm %s5151_s5, 32 }
  0xad   :  { %p4182_p8 = scmp.ne.s32.totalorder %s5151_s5, %s4181_s2  ;;  %p4185_p9 = scmp.lt.u32.totalorder %s4181_s2, %s5151_s5 }
  0xaf   :  { %p4187_p10 = pnand %p4185_p9, %p4182_p8 }
  0xb1   :  { %4190 = shalt.err (!%p4187_p10)
}
  0xb2   :  { %s4191_s28 = scalar_lea.vmem %s85_s13, 32  ;;  %p4196_p12 = scmp.lt.s32.totalorder %s85_s13, %s85_s13 }
  0xb3   :  { %p4192_p11 = scmp.ne.s32.totalorder %s85_s13, %s4191_s28  ;;  %p4197_p13 = scmp.lt.s32.totalorder %s4191_s28, %s4191_s28 }
  0xb5   :  { %p4198_p0 = por %p4197_p13, %p4196_p12 }
  0xb7   :  { %p4199_p1 = pnand %p4198_p0, %p4192_p11 }
  0xb9   :  { %4202 = shalt.err (!%p4199_p1)
}
  0xba   :  { %90 = dma.hbm_to_vmem [thread:$0]  %s5151_s5, 32, %s85_s13, [#allocation9], %s4335_s26, %s4335_s26, %s4336_s3  }
  0xbb   :  { %s4203_s30 = scalar_lea.hbm %s5154_s8, 32 }
  0xbc   :  { %p4204_p2 = scmp.ne.s32.totalorder %s5154_s8, %s4203_s30  ;;  %p4207_p3 = scmp.lt.u32.totalorder %s4203_s30, %s5154_s8 }
  0xbe   :  { %p4209_p4 = pnand %p4207_p3, %p4204_p2 }
  0xc0   :  { %4212 = shalt.err (!%p4209_p4)
}
  0xc1   :  { %s4213_s21 = scalar_lea.vmem %s4603_s1, 32  ;;  %p4218_p6 = scmp.lt.s32.totalorder %s4603_s1, %s4603_s1 }
  0xc2   :  { %p4214_p5 = scmp.ne.s32.totalorder %s4603_s1, %s4213_s21  ;;  %p4219_p7 = scmp.lt.s32.totalorder %s4213_s21, %s4213_s21 }
  0xc4   :  { %p4220_p8 = por %p4219_p7, %p4218_p6 }
  0xc6   :  { %p4221_p9 = pnand %p4220_p8, %p4214_p5 }
  0xc8   :  { %4224 = shalt.err (!%p4221_p9)
}
  0xc9   :  { %116 = dma.hbm_to_vmem [thread:$0]  %s5154_s8, 32, %s4603_s1, [#allocation12], %s4335_s26, %s4335_s26, %s4336_s3  }
  0xca   :  { %s4343_s27 = smov [#allocation16]   ;;  %s4344_s29 = smov [#allocation19]  }
  0xcb   :  { %s136_s4 = sshll.u32 %s4343_s27, 4  ;;  %s162_s28 = sshll.u32 %s4344_s29, 4  ;;  %s137_s4 = int_to_ptr.vmem [resolvable:$true] %s136_s4  ;;  %s4640_s28 = int_to_ptr.vmem [resolvable:$true] %s162_s28 }
  0xcc   :  { %s4225_s22 = scalar_lea.hbm %s5157_s11, 32 }
  0xcd   :  { %p4226_p10 = scmp.ne.s32.totalorder %s5157_s11, %s4225_s22  ;;  %p4229_p11 = scmp.lt.u32.totalorder %s4225_s22, %s5157_s11 }
  0xcf   :  { %p4231_p12 = pnand %p4229_p11, %p4226_p10 }
  0xd1   :  { %4234 = shalt.err (!%p4231_p12)
}
  0xd2   :  { %s4235_s8 = scalar_lea.vmem %s137_s4, 32  ;;  %p4240_p0 = scmp.lt.s32.totalorder %s137_s4, %s137_s4 }
  0xd3   :  { %p4236_p13 = scmp.ne.s32.totalorder %s137_s4, %s4235_s8  ;;  %p4241_p1 = scmp.lt.s32.totalorder %s4235_s8, %s4235_s8 }
  0xd5   :  { %p4242_p2 = por %p4241_p1, %p4240_p0 }
  0xd7   :  { %p4243_p3 = pnand %p4242_p2, %p4236_p13 }
  0xd9   :  { %4246 = shalt.err (!%p4243_p3)
}
  0xda   :  { %142 = dma.hbm_to_vmem [thread:$0]  %s5157_s11, 32, %s137_s4, [#allocation15], %s4335_s26, %s4335_s26, %s4336_s3  }
  0xdb   :  { %s4247_s5 = scalar_lea.hbm %s5160_s14, 32 }
  0xdc   :  { %p4248_p4 = scmp.ne.s32.totalorder %s5160_s14, %s4247_s5  ;;  %p4251_p5 = scmp.lt.u32.totalorder %s4247_s5, %s5160_s14 }
  0xde   :  { %p4253_p6 = pnand %p4251_p5, %p4248_p4 }
  0xe0   :  { %4256 = shalt.err (!%p4253_p6)
}
  0xe1   :  { %s4257_s15 = scalar_lea.vmem %s4640_s28, 32  ;;  %p4262_p8 = scmp.lt.s32.totalorder %s4640_s28, %s4640_s28 }
  0xe2   :  { %p4258_p7 = scmp.ne.s32.totalorder %s4640_s28, %s4257_s15  ;;  %p4263_p9 = scmp.lt.s32.totalorder %s4257_s15, %s4257_s15 }
  0xe4   :  { %p4264_p10 = por %p4263_p9, %p4262_p8 }
  0xe6   :  { %p4265_p11 = pnand %p4264_p10, %p4258_p7 }
  0xe8   :  { %4268 = shalt.err (!%p4265_p11)
}
  0xe9   :  { %168 = dma.hbm_to_vmem [thread:$0]  %s5160_s14, 32, %s4640_s28, [#allocation18], %s4335_s26, %s4335_s26, %s4336_s3  }
  0xea   :  { %s4345_s22 = smov [#allocation22]   ;;  %s4269_s9 = scalar_lea.hbm %s5163_s17, 16 }
  0xeb   :  { %s189_s24 = sshll.u32 %s4345_s22, 4  ;;  %p4270_p12 = scmp.ne.s32.totalorder %s5163_s17, %s4269_s9  ;;  %s190_s24 = int_to_ptr.vmem [resolvable:$true] %s189_s24 }
  0xec   :  { %p4273_p13 = scmp.lt.u32.totalorder %s4269_s9, %s5163_s17 }
  0xee   :  { %p4275_p0 = pnand %p4273_p13, %p4270_p12 }
  0xf0   :  { %4278 = shalt.err (!%p4275_p0)
}
  0xf1   :  { %s4279_s21 = scalar_lea.vmem %s190_s24, 16  ;;  %s4283_s14 = scalar_lea.vmem %s190_s24, 32 }
  0xf2   :  { %p4280_p1 = scmp.ne.s32.totalorder %s190_s24, %s4279_s21  ;;  %p4284_p2 = scmp.lt.s32.totalorder %s190_s24, %s190_s24 }
  0xf3   :  { %p4285_p3 = scmp.lt.s32.totalorder %s4283_s14, %s4279_s21 }
  0xf5   :  { %p4286_p4 = por %p4285_p3, %p4284_p2 }
  0xf7   :  { %p4287_p5 = pnand %p4286_p4, %p4280_p1 }
  0xf9   :  { %4290 = shalt.err (!%p4287_p5)
}
  0xfa   :  { %192 = dma.hbm_to_vmem [thread:$0]  %s5163_s17, 16, %s190_s24, [#allocation21]  }
  0xfb   :  { %4313 = dma.done.wait [#allocation3], 256  }
  0xfc   :  { %4314 = vsyncadd [#allocation3], 4294967040 }
  0xfd   :  { %4315 = dma.done.wait [#allocation6], 272  }
  0xfe   :  { %4316 = vsyncadd [#allocation6], 4294967024 }
  0xff   :  { %4317 = dma.done.wait [#allocation9], 48  }
 0x100   :  { %4318 = vsyncadd [#allocation9], 4294967248 }
 0x101   :  { %4319 = dma.done.wait [#allocation12], 64  }
 0x102   :  { %4320 = vsyncadd [#allocation12], 4294967232 }
 0x103   :  { %4321 = dma.done.wait [#allocation15], 64  }
 0x104   :  { %4322 = vsyncadd [#allocation15], 4294967232 }
 0x105   :  { %4323 = dma.done.wait [#allocation18], 64  }
 0x106   :  { %4324 = vsyncadd [#allocation18], 4294967232 }
 0x107   :  { %4325 = dma.done.wait [#allocation21], 48  }
 0x108   :  { %4326 = vsyncadd [#allocation21], 4294967248  ;;  %vm240_vm0 = vcmask 261120   ;;  %v236_v0 = vld [vmem:[#allocation2] sm:$0xff]  ;;  %v237_v1 = vld [vmem:[#allocation2 + $0x8] sm:$0xff]  ;;  %s5188_s13 = sld [smem:[#allocation36_spill]] }
 0x109   :  { %v241_v2 = vsel %vm240_vm0, %v236_v0, 0.0  ;;  %v244_v3 = vsel %vm240_vm0, %v237_v1, 0.0  ;;  %v3150_v27 = vld [vmem:[#allocation7] ss:$0 sm:$0xff]  ;;  %v3151_v29 = vld [vmem:[#allocation8] ss:$0 sm:$0xff] }
 0x10a   :  { %242 = vadd.xlane.f32.xlu0 %v241_v2  ;;  %v3152_v36 = vld [vmem:[#allocation10] ss:$0 sm:$0xff]  ;;  %vm384_vm1 = vcmask 64512   ;;  %s4346_s22 = smov 88   ;;  %s4347_s24 = smov 96   ;;  %v4749_v54 = vld [vmem:[#allocation5 + $0x8] sm:$0xff] }
 0x10b   :  { %s4348_s30 = smov 120   ;;  %vm4733_vm2 = vmpackc.low %vm384_vm1, %vm384_vm1  ;;  %v4751_v57 = vld [vmem:[#allocation5] sm:$0xff]  ;;  %vm472_vm3 = vcmask 130048   ;;  %s4349_s23 = smov 56   ;;  %vm1222_vm4 = vcmask 195584   ;;  %vm1488_vm5 = vcmask 523264  }
 0x10c   :  { %s4350_s9 = smov 64   ;;  %s4351_s8 = smov 80   ;;  %vm4359_vm6 = vmmov 0   ;;  %vm2957_vm7 = vcmask 1040384  }
 0x10d   :  { %s4352_s1 = smov 112   ;;  %s4353_s25 = smov 48  }
 0x10e   :  { %245 = vadd.xlane.f32.xlu0 %v244_v3  ;;  %v286_v14 = vld [vmem:[%s5188_s13] sm:$0xff]  ;;  %v287_v15 = vld [vmem:[%s5188_s13 + $0x8] sm:$0xff]  ;;  %v288_v16 = vld [vmem:[%s5188_s13 + $0x10] sm:$0xff]  ;;  %s4354_s2 = smov 104   ;;  %s4355_s21 = smov 72  }
 0x10f   :  { %v3624_v17 = vpack.c.bf16 %v287_v15, %v286_v14  ;;  %v289_v18 = vld [vmem:[%s5188_s13 + $0x18] sm:$0xff]  ;;  %s4356_s14 = smov 40   ;;  %s5175_s11 = smov 24  }
 0x110   :  { %v3628_v19 = vpack.c.bf16 %v289_v18, %v288_v16  ;;  %s4361_s4 = smov [#allocation23]  }
 0x111   :  { %3625 = vmatprep.subr.bf16.mxu0 %v3624_v17  ;;  %s3135_s3 = sshll.u32 %s4361_s4, 4  ;;  %s3136_s3 = int_to_ptr.vmem [resolvable:$true] %s3135_s3 }
 0x112   :  { %3627 = vmatpush3.bf16.msra.mxu0 %v3624_v17  ;;  %p4296_p7 = scmp.lt.s32.totalorder %s3136_s3, %s3136_s3 }
 0x113   :  { %3629 = vmatprep.subr.bf16.mxu0 %v3628_v19 }
 0x116   :  { %3631 = vmatpush3.bf16.msra.mxu0 %v3628_v19 }
 0x197   :  { %v243_v4 = vpop.xlane.xlu0 %242 }
 0x198   :  { %v248_v5 = vmul.f32 0.03125, %v243_v4 }
 0x19a   :  { %v250_v6 = vsub.f32 %v236_v0, %v248_v5 }
 0x19b   :  { %v246_v7 = vpop.xlane.xlu0 %245 }
 0x19c   :  { %v249_v8 = vmul.f32 0.03125, %v246_v7  ;;  %v252_v9 = vmul.f32 %v250_v6, %v250_v6 }
 0x19e   :  { %v251_v10 = vsub.f32 %v237_v1, %v249_v8  ;;  %v254_v11 = vsel %vm240_vm0, %v252_v9, 0.0 }
 0x19f   :  { %255 = vadd.xlane.f32.xlu1 %v254_v11 }
 0x1a0   :  { %v253_v12 = vmul.f32 %v251_v10, %v251_v10 }
 0x1a2   :  { %v257_v13 = vsel %vm240_vm0, %v253_v12, 0.0 }
 0x1a3   :  { %258 = vadd.xlane.f32.xlu1 %v257_v13 }
 0x22c   :  { %v256_v20 = vpop.xlane.xlu1 %255 }
 0x22d   :  { %v260_v21 = vmul.f32 0.03125, %v256_v20 }
 0x22f   :  { %v262_v22 = vadd.f32 1e-12, %v260_v21 }
 0x230   :  { %v259_v23 = vpop.xlane.xlu1 %258 }
 0x231   :  { %3909 = vrsqrt.f32 %v262_v22  ;;  %v261_v24 = vmul.f32 0.03125, %v259_v23 }
 0x233   :  { %v263_v25 = vadd.f32 1e-12, %v261_v24 }
 0x235   :  { %3911 = vrsqrt.f32 %v263_v25 }
 0x23b   :  { %v3910_v26 = vpop.eup %3909 }
 0x23c   :  { %v266_v28 = vmul.f32 %v3910_v26, %v250_v6 }
 0x23e   :  { %v274_v30 = vmul.f32 %v3150_v27, %v266_v28 }
 0x23f   :  { %v3912_v31 = vpop.eup %3911 }
 0x240   :  { %v267_v32 = vmul.f32 %v3912_v31, %v251_v10  ;;  %v4705_v33 = vadd.f32 %v3151_v29, %v274_v30 }
 0x242   :  { %v275_v34 = vmul.f32 %v3150_v27, %v267_v32  ;;  %3394 = vmatprep.mubr.msk.f32.mxu0 %vm240_vm0, %v4705_v33 }
 0x244   :  { %v4709_v35 = vadd.f32 %v3151_v29, %v275_v34 }
 0x246   :  { %3395 = vmatmul.mubr.msk.f32.vlgmr.msra.gmra.mrb[0].mxu0 %vm240_vm0, %v4709_v35 }
 0x319   :  { %v3396_v37 = vpop.f32.mrb[0].mxu0 }
 0x31a   :  { %v4713_v38 = vadd.f32 %v3396_v37, %v3152_v36  ;;  %v369_v39 = vpop.f32.mrb[1].mxu0 }
 0x31b   :  { %v4715_v40 = vadd.f32 %v3152_v36, %v369_v39 }
 0x31d   :  { %3401 = vmatprep.mubr.msk.f32.mxu1 %vm384_vm1, %v4715_v40  ;;  %v4721_v41 = vpack.i.bf16 %v4713_v38, %v4715_v40 }
 0x31f   :  { %3835 = vrot.lane.b32.xlu1 %v4721_v41, %s4346_s22  ;;  %3830 = vrot.lane.b32.xlu0 %v4721_v41, %s4347_s24 }
 0x323   :  { %582 = vrot.lane.b32.xlu1 %v4715_v40, %s4348_s30 }
 0x327   :  { %584 = vrot.lane.b32.xlu1 %v4713_v38, %s4348_s30 }
 0x391   :  { %v3836_v42 = vpop.permute.xlu1 %3835  ;;  %v3831_v43 = vpop.permute.xlu0 %3830 }
 0x392   :  { %v3838_v44 = vunpack.i.h.bf16 %v3836_v42  ;;  %v3837_v45 = vunpack.i.l.bf16 %v3836_v42  ;;  %v3833_v46 = vunpack.i.h.bf16 %v3831_v43  ;;  %v3832_v47 = vunpack.i.l.bf16 %v3831_v43 }
 0x394   :  { %v3632_v49 = vpack.c.bf16 %v3833_v46, %v3832_v47  ;;  %v3642_v50 = vpack.c.bf16 %v3838_v44, %v3837_v45 }
 0x395   :  { %v583_v51 = vpop.permute.xlu1 %582 }
 0x396   :  { %3634 = vmatprep.subr.msk.bf16.mxu1 %vm4733_vm2, %v3632_v49 }
 0x397   :  { %3637 = vmatpush3.bf16.xpose.msk.msra.mxu1 %vm4733_vm2, %v3632_v49 }
 0x398   :  { %3644 = vmatprep.subr.msk.bf16.mxu1 %vm4733_vm2, %v3642_v50 }
 0x399   :  { %v585_v52 = vpop.permute.xlu1 %584 }
 0x39e   :  { %3402 = vmatmul.mubr.msk.f32.vlgmr.msra.gmra.mrb[0].mxu1 %vm384_vm1, %v4713_v38 }
 0x39f   :  { %3647 = vmatpush3.bf16.xpose.msk.msra.mxu1 %vm4733_vm2, %v3642_v50  ;;  %3415 = vmatprep.mubr.msk.f32.mxu1 %vm384_vm1, %v583_v51 }
 0x3a6   :  { %3416 = vmatmul.mubr.msk.f32.vlgmr.msra.gmra.mrb[2].mxu1 %vm384_vm1, %v585_v52 }
 0x471   :  { %v3403_v53 = vpop.f32.mrb[0].mxu1 }
 0x472   :  { %v469_v55 = vmul.f32 0.35355338, %v3403_v53  ;;  %v459_v56 = vpop.f32.mrb[1].mxu1 }
 0x473   :  { %v468_v58 = vmul.f32 0.35355338, %v459_v56 }
 0x474   :  { %v471_v59 = vadd.f32 %v469_v55, %v4749_v54 }
 0x475   :  { %v470_v60 = vadd.f32 %v468_v58, %v4751_v57 }
 0x476   :  { %v476_v61 = vsel %vm472_vm3, %v471_v59, -inf }
 0x477   :  { %477 = vmax.xlane.f32.xlu1 %v476_v61  ;;  %v473_v62 = vsel %vm472_vm3, %v470_v60, -inf }
 0x478   :  { %474 = vmax.xlane.f32.xlu0 %v473_v62 }
 0x479   :  { %v3417_v63 = vpop.f32.mrb[2].mxu1 }
 0x47a   :  { %v664_v0 = vpop.f32.mrb[3].mxu1  ;;  %v674_v1 = vmul.f32 0.35355338, %v3417_v63 }
 0x47b   :  { %v673_v2 = vmul.f32 0.35355338, %v664_v0 }
 0x47c   :  { %v676_v5 = vadd.f32 %v674_v1, %v4749_v54 }
 0x47d   :  { %v675_v3 = vadd.f32 %v673_v2, %v4751_v57 }
 0x47e   :  { %v680_v6 = vsel %vm472_vm3, %v676_v5, -inf }
 0x47f   :  { %v677_v4 = vsel %vm472_vm3, %v675_v3, -inf }
 0x480   :  { %678 = vmax.xlane.f32.xlu0 %v677_v4 }
 0x484   :  { %681 = vmax.xlane.f32.xlu0 %v680_v6 }
 0x504   :  { %v478_v7 = vpop.xlane.xlu1 %477 }
 0x505   :  { %v480_v8 = vsub.f32 %v471_v59, %v478_v7  ;;  %v475_v9 = vpop.xlane.xlu0 %474 }
 0x506   :  { %v479_v10 = vsub.f32 %v470_v60, %v475_v9 }
 0x507   :  { %v483_v11 = vmul.f32 1.442695, %v480_v8 }
 0x508   :  { %v481_v12 = vmul.f32 1.442695, %v479_v10 }
 0x509   :  { %3913 = vpow2.f32 %v483_v11 }
 0x50a   :  { %3915 = vpow2.f32 %v481_v12 }
 0x50d   :  { %v679_v13 = vpop.xlane.xlu0 %678 }
 0x50e   :  { %v683_v14 = vsub.f32 %v675_v3, %v679_v13 }
 0x510   :  { %v685_v15 = vmul.f32 1.442695, %v683_v14 }
 0x511   :  { %v682_v16 = vpop.xlane.xlu0 %681 }
 0x512   :  { %3917 = vpow2.f32 %v685_v15  ;;  %v684_v17 = vsub.f32 %v676_v5, %v682_v16 }
 0x513   :  { %v3914_v18 = vpop.eup %3913 }
 0x514   :  { %v3916_v19 = vpop.eup %3915  ;;  %v687_v20 = vmul.f32 1.442695, %v684_v17  ;;  %v488_v21 = vsel %vm472_vm3, %v3914_v18, 0.0 }
 0x515   :  { %489 = vadd.xlane.f32.xlu1 %v488_v21  ;;  %v485_v22 = vsel %vm472_vm3, %v3916_v19, 0.0 }
 0x516   :  { %3919 = vpow2.f32 %v687_v20  ;;  %486 = vadd.xlane.f32.xlu0 %v485_v22 }
 0x51c   :  { %v3918_v23 = vpop.eup %3917 }
 0x51d   :  { %v689_v24 = vsel %vm472_vm3, %v3918_v23, 0.0 }
 0x51e   :  { %690 = vadd.xlane.f32.xlu0 %v689_v24 }
 0x520   :  { %v3920_v25 = vpop.eup %3919 }
 0x521   :  { %v692_v26 = vsel %vm472_vm3, %v3920_v25, 0.0 }
 0x522   :  { %693 = vadd.xlane.f32.xlu1 %v692_v26 }
 0x533   :  { %3845 = vrot.lane.b32.xlu1 %v4721_v41, %s4349_s23 }
 0x534   :  { %3840 = vrot.lane.b32.xlu0 %v4721_v41, %s4350_s9 }
 0x537   :  { %3850 = vrot.lane.b32.xlu1 %v4721_v41, %s4351_s8 }
 0x538   :  { %788 = vrot.lane.b32.xlu0 %v4713_v38, %s4352_s1 }
 0x53b   :  { %786 = vrot.lane.b32.xlu1 %v4715_v40, %s4352_s1 }
 0x5a2   :  { %v490_v28 = vpop.xlane.xlu1 %489 }
 0x5a3   :  { %v487_v27 = vpop.xlane.xlu0 %486 }
 0x5a4   :  { %3921 = vrcp.f32 %v487_v27 }
 0x5a5   :  { %3923 = vrcp.f32 %v490_v28 }
 0x5ab   :  { %v691_v29 = vpop.xlane.xlu0 %690 }
 0x5ac   :  { %3925 = vrcp.f32 %v691_v29 }
 0x5ae   :  { %v3922_v30 = vpop.eup %3921 }
 0x5af   :  { %v694_v31 = vpop.xlane.xlu1 %693  ;;  %v3841_v32 = vpop.permute.xlu0 %3840  ;;  %v493_v34 = vmul.f32 %v3922_v30, %v3916_v19 }
 0x5b0   :  { %3927 = vrcp.f32 %v694_v31  ;;  %v3843_v36 = vunpack.i.h.bf16 %v3841_v32  ;;  %v3842_v37 = vunpack.i.l.bf16 %v3841_v32  ;;  %v3924_v42 = vpop.eup %3923 }
 0x5b1   :  { %3408 = vmatprep.mubr.msk.f32.mxu0 %vm472_vm3, %v493_v34  ;;  %v494_v47 = vmul.f32 %v3924_v42, %v3914_v18 }
 0x5b2   :  { %v3638_v39 = vpack.c.bf16 %v3843_v36, %v3842_v37 }
 0x5b3   :  { %v3846_v43 = vpop.permute.xlu1 %3845  ;;  %v789_v60 = vpop.permute.xlu0 %788 }
 0x5b4   :  { %v3848_v44 = vunpack.i.h.bf16 %v3846_v43  ;;  %v3847_v45 = vunpack.i.l.bf16 %v3846_v43  ;;  %3639 = vmatprep.subr.bf16.mxu0 %v3638_v39 }
 0x5b5   :  { %3641 = vmatpush3.bf16.msra.mxu0 %v3638_v39 }
 0x5b6   :  { %v3926_v46 = vpop.eup %3925  ;;  %v3648_v49 = vpack.c.bf16 %v3848_v44, %v3847_v45 }
 0x5b7   :  { %v3851_v50 = vpop.permute.xlu1 %3850  ;;  %v697_v51 = vmul.f32 %v3926_v46, %v3918_v23 }
 0x5b8   :  { %v3853_v52 = vunpack.i.h.bf16 %v3851_v50  ;;  %v3852_v53 = vunpack.i.l.bf16 %v3851_v50  ;;  %3409 = vmatmul.mubr.msk.f32.vlgmr.msra.gmra.mrb[2].mxu0 %vm472_vm3, %v494_v47  ;;  %3649 = vmatprep.subr.bf16.mxu0 %v3648_v49 }
 0x5b9   :  { %3651 = vmatpush3.bf16.msra.mxu0 %v3648_v49  ;;  %3422 = vmatprep.mubr.msk.f32.mxu0 %vm472_vm3, %v697_v51 }
 0x5ba   :  { %v3928_v55 = vpop.eup %3927  ;;  %v3652_v56 = vpack.c.bf16 %v3853_v52, %v3852_v53 }
 0x5bb   :  { %v698_v58 = vmul.f32 %v3928_v55, %v3920_v25  ;;  %v787_v59 = vpop.permute.xlu1 %786 }
 0x5bc   :  { %3654 = vmatprep.subr.msk.bf16.mxu0 %vm4733_vm2, %v3652_v56 }
 0x5bd   :  { %3423 = vmatmul.mubr.msk.f32.vlgmr.msra.gmra.mrb[4].mxu0 %vm472_vm3, %v698_v58 }
 0x5be   :  { %3429 = vmatprep.mubr.msk.f32.mxu0 %vm384_vm1, %v787_v59 }
 0x5c2   :  { %3657 = vmatpush3.bf16.xpose.msk.msra.mxu0 %vm4733_vm2, %v3652_v56 }
 0x5c9   :  { %3430 = vmatmul.mubr.msk.f32.vlgmr.msra.gmra.mrb[6].mxu0 %vm384_vm1, %v789_v60 }
 0x68b   :  { %v4785_v61 = vpop.f32.mrb[2].mxu0 }
 0x68c   :  { %v4787_v62 = vpop.f32.mrb[3].mxu0 }
 0x690   :  { %v4789_v63 = vpop.f32.mrb[4].mxu0 }
 0x691   :  { %v4791_v0 = vpop.f32.mrb[5].mxu0 }
 0x69c   :  { %v3431_v1 = vpop.f32.mrb[6].mxu0 }
 0x69d   :  { %v878_v2 = vmul.f32 0.35355338, %v3431_v1  ;;  %v868_v3 = vpop.f32.mrb[7].mxu0 }
 0x69e   :  { %v877_v4 = vmul.f32 0.35355338, %v868_v3 }
 0x69f   :  { %v880_v5 = vadd.f32 %v878_v2, %v4749_v54 }
 0x6a0   :  { %v879_v6 = vadd.f32 %v877_v4, %v4751_v57 }
 0x6a1   :  { %v884_v7 = vsel %vm472_vm3, %v880_v5, -inf }
 0x6a2   :  { %885 = vmax.xlane.f32.xlu0 %v884_v7  ;;  %v881_v8 = vsel %vm472_vm3, %v879_v6, -inf }
 0x6a3   :  { %882 = vmax.xlane.f32.xlu1 %v881_v8 }
 0x6b4   :  { %3855 = vrot.lane.b32.xlu1 %v4721_v41, %s4353_s25 }
 0x6b8   :  { %990 = vrot.lane.b32.xlu1 %v4715_v40, %s4354_s2 }
 0x6bc   :  { %992 = vrot.lane.b32.xlu1 %v4713_v38, %s4354_s2 }
 0x72f   :  { %v886_v9 = vpop.xlane.xlu0 %885 }
 0x730   :  { %v888_v10 = vsub.f32 %v880_v5, %v886_v9  ;;  %v883_v11 = vpop.xlane.xlu1 %882  ;;  %v1225_v9 = vld [vmem:[%s5152_s6] sm:$0xff] }
 0x731   :  { %v887_v12 = vsub.f32 %v879_v6, %v883_v11 }
 0x732   :  { %v891_v13 = vmul.f32 1.442695, %v888_v10  ;;  %v1227_v10 = vld [vmem:[%s5152_s6 + $0x10] sm:$0xff] }
 0x733   :  { %v889_v14 = vmul.f32 1.442695, %v887_v12  ;;  %v1228_v12 = vld [vmem:[%s5152_s6 + $0x18] sm:$0xff] }
 0x734   :  { %3929 = vpow2.f32 %v891_v13  ;;  %v3856_v15 = vpop.permute.xlu1 %3855  ;;  %v3676_v13 = vpack.c.bf16 %v1228_v12, %v1227_v10  ;;  %v1476_v12 = vld [vmem:[%s5158_s12 + $0x18] sm:$0xff] }
 0x735   :  { %v3858_v16 = vunpack.i.h.bf16 %v3856_v15  ;;  %v3857_v17 = vunpack.i.l.bf16 %v3856_v15  ;;  %3931 = vpow2.f32 %v889_v14 }
 0x737   :  { %v3658_v18 = vpack.c.bf16 %v3858_v16, %v3857_v17 }
 0x738   :  { %v991_v31 = vpop.permute.xlu1 %990 }
 0x739   :  { %3659 = vmatprep.subr.bf16.mxu1 %v3658_v18 }
 0x73a   :  { %3661 = vmatpush3.bf16.msra.mxu1 %v3658_v18 }
 0x73c   :  { %v993_v32 = vpop.permute.xlu1 %992 }
 0x73e   :  { %v3930_v19 = vpop.eup %3929 }
 0x73f   :  { %v896_v40 = vsel %vm472_vm3, %v3930_v19, 0.0  ;;  %v3932_v20 = vpop.eup %3931 }
 0x740   :  { %897 = vadd.xlane.f32.xlu0 %v896_v40  ;;  %v893_v38 = vsel %vm472_vm3, %v3932_v20, 0.0 }
 0x744   :  { %894 = vadd.xlane.f32.xlu0 %v893_v38 }
 0x75a   :  { %3860 = vrot.lane.b32.xlu0 %v4721_v41, %s4355_s21 }
 0x7cd   :  { %v898_v21 = vpop.xlane.xlu0 %897 }
 0x7ce   :  { %3933 = vrcp.f32 %v898_v21 }
 0x7d1   :  { %v895_v22 = vpop.xlane.xlu0 %894 }
 0x7d2   :  { %3935 = vrcp.f32 %v895_v22 }
 0x7d5   :  { %v3861_v23 = vpop.permute.xlu0 %3860 }
 0x7d6   :  { %v3863_v24 = vunpack.i.h.bf16 %v3861_v23  ;;  %v3862_v25 = vunpack.i.l.bf16 %v3861_v23 }
 0x7d8   :  { %v3662_v26 = vpack.c.bf16 %v3863_v24, %v3862_v25  ;;  %v3934_v27 = vpop.eup %3933 }
 0x7d9   :  { %v902_v30 = vmul.f32 %v3934_v27, %v3930_v19 }
 0x7da   :  { %3664 = vmatprep.subr.msk.bf16.mxu1 %vm4733_vm2, %v3662_v26 }
 0x7dc   :  { %v3936_v28 = vpop.eup %3935 }
 0x7dd   :  { %v901_v29 = vmul.f32 %v3936_v28, %v3932_v20 }
 0x7df   :  { %3436 = vmatprep.mubr.msk.f32.mxu1 %vm472_vm3, %v901_v29 }
 0x7e0   :  { %3437 = vmatmul.mubr.msk.f32.vlgmr.msra.gmra.mrb[4].mxu1 %vm472_vm3, %v902_v30 }
 0x7e1   :  { %3667 = vmatpush3.bf16.xpose.msk.msra.mxu1 %vm4733_vm2, %v3662_v26  ;;  %3443 = vmatprep.mubr.msk.f32.mxu1 %vm384_vm1, %v991_v31  ;;  %v3179_v26 = vld [vmem:[#allocation11] ss:$0 sm:$0xff] }
 0x7e8   :  { %3444 = vmatmul.mubr.msk.f32.vlgmr.msra.gmra.mrb[6].mxu1 %vm384_vm1, %v993_v32 }
 0x8b3   :  { %v3438_v34 = vpop.f32.mrb[4].mxu1 }
 0x8b4   :  { %v981_v36 = vpop.f32.mrb[5].mxu1 }
 0x8bb   :  { %v3445_v37 = vpop.f32.mrb[6].mxu1 }
 0x8bc   :  { %v1082_v39 = vmul.f32 0.35355338, %v3445_v37  ;;  %v1072_v42 = vpop.f32.mrb[7].mxu1 }
 0x8bd   :  { %v1081_v43 = vmul.f32 0.35355338, %v1072_v42 }
 0x8be   :  { %v1084_v44 = vadd.f32 %v1082_v39, %v4749_v54 }
 0x8bf   :  { %v1083_v45 = vadd.f32 %v1081_v43, %v4751_v57 }
 0x8c0   :  { %v1088_v46 = vsel %vm472_vm3, %v1084_v44, -inf }
 0x8c1   :  { %1089 = vmax.xlane.f32.xlu0 %v1088_v46  ;;  %v1085_v47 = vsel %vm472_vm3, %v1083_v45, -inf }
 0x8c2   :  { %1086 = vmax.xlane.f32.xlu1 %v1085_v47  ;;  %v1364_v47 = vld [vmem:[%s5156_s10 + $0x8] sm:$0xff] }
 0x8d3   :  { %3865 = vrot.lane.b32.xlu1 %v4721_v41, %s4356_s14 }
 0x8d7   :  { %1198 = vrot.lane.b32.xlu1 %v4789_v63, %s5185_s0 }
 0x8db   :  { %1204 = vrot.lane.b32.xlu1 %v981_v36, %s4335_s26 }
 0x8df   :  { %1206 = vrot.lane.b32.xlu1 %v3438_v34, %s4335_s26 }
 0x94e   :  { %v1090_v49 = vpop.xlane.xlu0 %1089 }
 0x94f   :  { %v1092_v50 = vsub.f32 %v1084_v44, %v1090_v49  ;;  %v1087_v51 = vpop.xlane.xlu1 %1086 }
 0x950   :  { %v1091_v52 = vsub.f32 %v1083_v45, %v1087_v51  ;;  %v1366_v51 = vld [vmem:[%s5156_s10 + $0x18] sm:$0xff] }
 0x951   :  { %v1095_v53 = vmul.f32 1.442695, %v1092_v50  ;;  %v1365_v50 = vld [vmem:[%s5156_s10 + $0x10] sm:$0xff] }
 0x952   :  { %v1093_v55 = vmul.f32 1.442695, %v1091_v52  ;;  %v3684_v52 = vpack.c.bf16 %v1366_v51, %v1365_v50 }
 0x953   :  { %v3866_v56 = vpop.permute.xlu1 %3865 }
 0x954   :  { %3937 = vpow2.f32 %v1093_v55  ;;  %v3868_v58 = vunpack.i.h.bf16 %v3866_v56  ;;  %v3867_v59 = vunpack.i.l.bf16 %v3866_v56 }
 0x955   :  { %3939 = vpow2.f32 %v1095_v53 }
 0x956   :  { %v3668_v60 = vpack.c.bf16 %v3868_v58, %v3867_v59 }
 0x957   :  { %v1199_v16 = vpop.permute.xlu1 %1198 }
 0x958   :  { %3669 = vmatprep.subr.bf16.mxu0 %v3668_v60  ;;  %v1219_v38 = vsel %vm384_vm1, %v4785_v61, %v1199_v16 }
 0x959   :  { %3671 = vmatpush3.bf16.msra.mxu0 %v3668_v60 }
 0x95b   :  { %v1205_v17 = vpop.permute.xlu1 %1204 }
 0x95e   :  { %v3938_v41 = vpop.eup %3937 }
 0x95f   :  { %v1097_v63 = vsel %vm472_vm3, %v3938_v41, 0.0  ;;  %v3940_v1 = vpop.eup %3939  ;;  %v1207_v19 = vpop.permute.xlu1 %1206 }
 0x960   :  { %1098 = vadd.xlane.f32.xlu0 %v1097_v63  ;;  %v1100_v2 = vsel %vm472_vm3, %v3940_v1, 0.0  ;;  %v1221_v23 = vsel %vm472_vm3, %v1219_v38, %v1207_v19  ;;  %v3182_v63 = vld [vmem:[#allocation13] ss:$0 sm:$0xff] }
 0x964   :  { %1101 = vadd.xlane.f32.xlu0 %v1100_v2  ;;  %v3183_v2 = vld [vmem:[#allocation14] ss:$0 sm:$0xff] }
 0x97a   :  { %1196 = vrot.lane.b32.xlu0 %v4791_v0, %s5185_s0  ;;  %v1226_v0 = vld [vmem:[%s5152_s6 + $0x8] sm:$0xff] }
 0x97b   :  { %v3672_v11 = vpack.c.bf16 %v1226_v0, %v1225_v9  ;;  %v1473_v9 = vld [vmem:[%s5158_s12] sm:$0xff]  ;;  %v1474_v0 = vld [vmem:[%s5158_s12 + $0x8] sm:$0xff] }
 0x97c   :  { %v3688_v10 = vpack.c.bf16 %v1474_v0, %v1473_v9 }
 0x97d   :  { %3673 = vmatprep.subr.bf16.mxu0 %v3672_v11 }
 0x9ed   :  { %v1099_v3 = vpop.xlane.xlu0 %1098 }
 0x9ee   :  { %3941 = vrcp.f32 %v1099_v3 }
 0x9f1   :  { %v1102_v4 = vpop.xlane.xlu0 %1101 }
 0x9f2   :  { %3943 = vrcp.f32 %v1102_v4 }
 0x9f5   :  { %v1197_v18 = vpop.permute.xlu0 %1196 }
 0x9f6   :  { %v1218_v40 = vsel %vm384_vm1, %v4787_v62, %v1197_v18  ;;  %v1480_v18 = vld [vmem:[%s5158_s12 + $0x38] sm:$0xff] }
 0x9f7   :  { %v1220_v21 = vsel %vm472_vm3, %v1218_v40, %v1205_v17  ;;  %v1479_v17 = vld [vmem:[%s5158_s12 + $0x30] sm:$0xff]  ;;  %v3184_v40 = vld [vmem:[#allocation16] ss:$0 sm:$0xff] }
 0x9f8   :  { %v3942_v5 = vpop.eup %3941  ;;  %v3700_v19 = vpack.c.bf16 %v1480_v18, %v1479_v17  ;;  %v3191_v18 = vld [vmem:[#allocation20] ss:$0 sm:$0xff] }
 0x9f9   :  { %v1105_v6 = vmul.f32 %v3942_v5, %v3938_v41 }
 0x9fb   :  { %3450 = vmatprep.mubr.msk.f32.mxu0 %vm472_vm3, %v1105_v6 }
 0x9fc   :  { %v3944_v7 = vpop.eup %3943 }
 0x9fd   :  { %v1106_v8 = vmul.f32 %v3944_v7, %v3940_v1 }
 0x9ff   :  { %3451 = vmatmul.mubr.msk.f32.vlgmr.msra.gmra.mrb[8].mxu0 %vm472_vm3, %v1106_v8 }
 0xa00   :  { %3675 = vmatpush3.bf16.msra.mxu0 %v3672_v11  ;;  %v1475_v11 = vld [vmem:[%s5158_s12 + $0x10] sm:$0xff] }
 0xa01   :  { %3677 = vmatprep.subr.bf16.mxu0 %v3676_v13 }
 0xa04   :  { %3679 = vmatpush3.bf16.msra.mxu0 %v3676_v13  ;;  %v1477_v13 = vld [vmem:[%s5158_s12 + $0x20] sm:$0xff] }
 0xa05   :  { %3689 = vmatprep.subr.bf16.mxu0 %v3688_v10 }
 0xad2   :  { %v3452_v14 = vpop.f32.mrb[8].mxu0 }
 0xad3   :  { %1214 = vrot.lane.b32.xlu1 %v3452_v14, %s5175_s11  ;;  %v1185_v15 = vpop.f32.mrb[9].mxu0  ;;  %v3692_v14 = vpack.c.bf16 %v1476_v12, %v1475_v11 }
 0xad4   :  { %1212 = vrot.lane.b32.xlu0 %v1185_v15, %s5175_s11  ;;  %v1478_v15 = vld [vmem:[%s5158_s12 + $0x28] sm:$0xff] }
 0xad5   :  { %v3696_v16 = vpack.c.bf16 %v1478_v15, %v1477_v13 }
 0xb45   :  { %v1215_v20 = vpop.permute.xlu1 %1214 }
 0xb46   :  { %v1213_v22 = vpop.permute.xlu0 %1212  ;;  %v1224_v25 = vsel %vm1222_vm4, %v1221_v23, %v1215_v20 }
 0xb47   :  { %v1223_v24 = vsel %vm1222_vm4, %v1220_v21, %v1213_v22 }
 0xb48   :  { %3461 = vmatprep.mubr.msk.f32.mxu0 %vm240_vm0, %v1223_v24 }
 0xb49   :  { %3462 = vmatmul.mubr.msk.f32.vlgmr.msra.gmra.mrb[10].mxu0 %vm240_vm0, %v1224_v25 }
 0xb4a   :  { %3691 = vmatpush3.bf16.msra.mxu0 %v3688_v10 }
 0xb4b   :  { %3693 = vmatprep.subr.bf16.mxu0 %v3692_v14 }
 0xb4e   :  { %3695 = vmatpush3.bf16.msra.mxu0 %v3692_v14  ;;  %v3190_v14 = vld [vmem:[#allocation19] ss:$0 sm:$0xff] }
 0xb4f   :  { %3697 = vmatprep.subr.bf16.mxu0 %v3696_v16 }
 0xb52   :  { %3699 = vmatpush3.bf16.msra.mxu0 %v3696_v16 }
 0xb53   :  { %3701 = vmatprep.subr.bf16.mxu0 %v3700_v19 }
 0xb56   :  { %3703 = vmatpush3.bf16.msra.mxu0 %v3700_v19 }
 0xc1c   :  { %v3463_v62 = vpop.f32.mrb[10].mxu0 }
 0xc1d   :  { %v1314_v27 = vadd.f32 %v3463_v62, %v3179_v26  ;;  %v1308_v28 = vpop.f32.mrb[11].mxu0 }
 0xc1e   :  { %v1309_v29 = vadd.f32 %v3179_v26, %v1308_v28 }
 0xc1f   :  { %v1318_v61 = vadd.f32 %v1314_v27, %v4709_v35 }
 0xc20   :  { %v1317_v30 = vadd.f32 %v1309_v29, %v4705_v33  ;;  %v1363_v33 = vld [vmem:[%s5156_s10] sm:$0xff] }
 0xc21   :  { %v1324_v31 = vsel %vm240_vm0, %v1318_v61, 0.0  ;;  %v3680_v49 = vpack.c.bf16 %v1364_v47, %v1363_v33 }
 0xc22   :  { %1325 = vadd.xlane.f32.xlu1 %v1324_v31  ;;  %v1321_v32 = vsel %vm240_vm0, %v1317_v30, 0.0 }
 0xc23   :  { %1322 = vadd.xlane.f32.xlu0 %v1321_v32  ;;  %3681 = vmatprep.subr.bf16.mxu1 %v3680_v49 }
 0xc24   :  { %3683 = vmatpush3.bf16.msra.mxu1 %v3680_v49 }
 0xc25   :  { %3685 = vmatprep.subr.bf16.mxu1 %v3684_v52 }
 0xc28   :  { %3687 = vmatpush3.bf16.msra.mxu1 %v3684_v52 }
 0xcaf   :  { %v1326_v34 = vpop.xlane.xlu1 %1325 }
 0xcb0   :  { %v1328_v36 = vmul.f32 0.03125, %v1326_v34  ;;  %v1323_v37 = vpop.xlane.xlu0 %1322 }
 0xcb1   :  { %v1327_v39 = vmul.f32 0.03125, %v1323_v37 }
 0xcb2   :  { %v1330_v42 = vsub.f32 %v1318_v61, %v1328_v36 }
 0xcb3   :  { %v1329_v43 = vsub.f32 %v1317_v30, %v1327_v39 }
 0xcb4   :  { %v1332_v46 = vmul.f32 %v1330_v42, %v1330_v42 }
 0xcb5   :  { %v1331_v44 = vmul.f32 %v1329_v43, %v1329_v43 }
 0xcb6   :  { %v1336_v35 = vsel %vm240_vm0, %v1332_v46, 0.0 }
 0xcb7   :  { %v1333_v45 = vsel %vm240_vm0, %v1331_v44, 0.0  ;;  %v3187_v44 = vld [vmem:[#allocation17] ss:$0 sm:$0xff] }
 0xcb8   :  { %1334 = vadd.xlane.f32.xlu0 %v1333_v45 }
 0xcbc   :  { %1337 = vadd.xlane.f32.xlu0 %v1336_v35 }
 0xd45   :  { %v1335_v53 = vpop.xlane.xlu0 %1334 }
 0xd46   :  { %v1339_v55 = vmul.f32 0.03125, %v1335_v53 }
 0xd48   :  { %v1341_v56 = vadd.f32 1e-12, %v1339_v55 }
 0xd49   :  { %v1338_v58 = vpop.xlane.xlu0 %1337 }
 0xd4a   :  { %3945 = vrsqrt.f32 %v1341_v56  ;;  %v1340_v59 = vmul.f32 0.03125, %v1338_v58 }
 0xd4c   :  { %v1342_v60 = vadd.f32 1e-12, %v1340_v59 }
 0xd4e   :  { %3947 = vrsqrt.f32 %v1342_v60 }
 0xd54   :  { %v3946_v41 = vpop.eup %3945 }
 0xd55   :  { %v1345_v1 = vmul.f32 %v3946_v41, %v1329_v43 }
 0xd57   :  { %v1353_v3 = vmul.f32 %v3182_v63, %v1345_v1 }
 0xd58   :  { %v3948_v4 = vpop.eup %3947 }
 0xd59   :  { %v1346_v5 = vmul.f32 %v3948_v4, %v1330_v42  ;;  %v1361_v6 = vadd.f32 %v3183_v2, %v1353_v3  ;;  %v3193_v3 = vld [vmem:[%s5188_s13 + $0x28] sm:$0xff] }
 0xd5b   :  { %v1354_v7 = vmul.f32 %v3182_v63, %v1346_v5  ;;  %3472 = vmatprep.mubr.msk.f32.mxu1 %vm240_vm0, %v1361_v6  ;;  %v3194_v5 = vld [vmem:[%s5188_s13 + $0x30] sm:$0xff] }
 0xd5d   :  { %v1362_v8 = vadd.f32 %v3183_v2, %v1354_v7  ;;  %v3192_v2 = vld [vmem:[%s5188_s13 + $0x20] sm:$0xff] }
 0xd5e   :  { %v3704_v4 = vpack.c.bf16 %v3193_v3, %v3192_v2 }
 0xd5f   :  { %3473 = vmatmul.mubr.msk.f32.vlgmr.msra.gmra.mrb[8].mxu1 %vm240_vm0, %v1362_v8 }
 0xd60   :  { %3705 = vmatprep.subr.bf16.mxu1 %v3704_v4 }
 0xd61   :  { %3707 = vmatpush3.bf16.msra.mxu1 %v3704_v4 }
 0xe32   :  { %v3474_v20 = vpop.f32.mrb[8].mxu1 }
 0xe33   :  { %v1452_v38 = vadd.f32 %v3474_v20, %v3184_v40  ;;  %v1446_v21 = vpop.f32.mrb[9].mxu1 }
 0xe34   :  { %v1447_v22 = vadd.f32 %v3184_v40, %v1446_v21  ;;  %v3196_v21 = vld [vmem:[#allocation10 + $0x1] ss:$0 sm:$0xff] }
 0xe35   :  { %v1458_v23 = vmul.f32 0.044715, %v1452_v38  ;;  %v1456_v39 = vmul.f32 0.5, %v1452_v38 }
 0xe36   :  { %v1457_v24 = vmul.f32 0.044715, %v1447_v22  ;;  %v1455_v36 = vmul.f32 0.5, %v1447_v22 }
 0xe37   :  { %v1460_v25 = vmul.f32 %v1458_v23, %v1452_v38 }
 0xe38   :  { %v1459_v26 = vmul.f32 %v1457_v24, %v1447_v22 }
 0xe39   :  { %v1462_v62 = vmul.f32 %v1460_v25, %v1452_v38 }
 0xe3a   :  { %v1461_v27 = vmul.f32 %v1459_v26, %v1447_v22 }
 0xe3b   :  { %v1464_v28 = vadd.f32 %v1462_v62, %v1452_v38 }
 0xe3c   :  { %v1463_v29 = vadd.f32 %v1461_v27, %v1447_v22 }
 0xe3d   :  { %v1466_v61 = vmul.f32 0.7978846, %v1464_v28 }
 0xe3e   :  { %v1465_v30 = vmul.f32 0.7978846, %v1463_v29 }
 0xe3f   :  { %3949 = vtanh.f32 %v1466_v61 }
 0xe40   :  { %3951 = vtanh.f32 %v1465_v30 }
 0xe49   :  { %v3950_v31 = vpop.eup %3949 }
 0xe4a   :  { %v3952_v32 = vpop.eup %3951  ;;  %v1470_v34 = vadd.f32 1.0, %v3950_v31 }
 0xe4b   :  { %v1469_v37 = vadd.f32 1.0, %v3952_v32 }
 0xe4c   :  { %v1472_v43 = vmul.f32 %v1470_v34, %v1456_v39 }
 0xe4d   :  { %v1471_v42 = vmul.f32 %v1469_v37, %v1455_v36 }
 0xe4f   :  { %3491 = vmatprep.mubr.msk.f32.mxu0 %vm1488_vm5, %v1471_v42 }
 0xe50   :  { %3492 = vmatmul.mubr.msk.f32.vlgmr.msra.gmra.mrb[12].mxu0 %vm1488_vm5, %v1472_v43 }
 0xf23   :  { %v3493_v45 = vpop.f32.mrb[12].mxu0 }
 0xf24   :  { %v1567_v46 = vadd.f32 %v3493_v45, %v3187_v44  ;;  %v1561_v35 = vpop.f32.mrb[13].mxu0 }
 0xf25   :  { %v1562_v33 = vadd.f32 %v3187_v44, %v1561_v35 }
 0xf26   :  { %v1571_v47 = vadd.f32 %v1567_v46, %v1362_v8 }
 0xf27   :  { %v1570_v49 = vadd.f32 %v1562_v33, %v1361_v6  ;;  %v3195_v6 = vld [vmem:[%s5188_s13 + $0x38] sm:$0xff] }
 0xf28   :  { %v1577_v50 = vsel %vm240_vm0, %v1571_v47, 0.0  ;;  %v3708_v7 = vpack.c.bf16 %v3195_v6, %v3194_v5 }
 0xf29   :  { %1578 = vadd.xlane.f32.xlu1 %v1577_v50  ;;  %v1574_v51 = vsel %vm240_vm0, %v1570_v49, 0.0 }
 0xf2a   :  { %1575 = vadd.xlane.f32.xlu0 %v1574_v51  ;;  %3709 = vmatprep.subr.bf16.mxu1 %v3708_v7 }
 0xf2b   :  { %3711 = vmatpush3.bf16.msra.mxu1 %v3708_v7 }
 0xfb6   :  { %v1579_v52 = vpop.xlane.xlu1 %1578 }
 0xfb7   :  { %v1581_v53 = vmul.f32 0.03125, %v1579_v52  ;;  %v1576_v55 = vpop.xlane.xlu0 %1575 }
 0xfb8   :  { %v1580_v56 = vmul.f32 0.03125, %v1576_v55 }
 0xfb9   :  { %v1583_v58 = vsub.f32 %v1571_v47, %v1581_v53 }
 0xfba   :  { %v1582_v59 = vsub.f32 %v1570_v49, %v1580_v56 }
 0xfbb   :  { %v1585_v60 = vmul.f32 %v1583_v58, %v1583_v58 }
 0xfbc   :  { %v1584_v41 = vmul.f32 %v1582_v59, %v1582_v59 }
 0xfbd   :  { %v1589_v63 = vsel %vm240_vm0, %v1585_v60, 0.0 }
 0xfbe   :  { %1590 = vadd.xlane.f32.xlu1 %v1589_v63  ;;  %v1586_v1 = vsel %vm240_vm0, %v1584_v41, 0.0 }
 0xfbf   :  { %1587 = vadd.xlane.f32.xlu0 %v1586_v1 }
0x104b   :  { %v1591_v8 = vpop.xlane.xlu1 %1590 }
0x104c   :  { %v1593_v9 = vmul.f32 0.03125, %v1591_v8  ;;  %v1588_v0 = vpop.xlane.xlu0 %1587 }
0x104d   :  { %v1592_v10 = vmul.f32 0.03125, %v1588_v0 }
0x104e   :  { %v1595_v11 = vadd.f32 1e-12, %v1593_v9 }
0x104f   :  { %v1594_v12 = vadd.f32 1e-12, %v1592_v10 }
0x1050   :  { %3953 = vrsqrt.f32 %v1595_v11 }
0x1051   :  { %3955 = vrsqrt.f32 %v1594_v12 }
0x105a   :  { %v3954_v13 = vpop.eup %3953 }
0x105b   :  { %v3956_v15 = vpop.eup %3955  ;;  %v1599_v16 = vmul.f32 %v3954_v13, %v1583_v58 }
0x105c   :  { %v1598_v17 = vmul.f32 %v3956_v15, %v1582_v59 }
0x105d   :  { %v1607_v19 = vmul.f32 %v3190_v14, %v1599_v16 }
0x105e   :  { %v1606_v40 = vmul.f32 %v3190_v14, %v1598_v17 }
0x105f   :  { %v4919_v38 = vadd.f32 %v3191_v18, %v1607_v19 }
0x1060   :  { %v4917_v20 = vadd.f32 %v3191_v18, %v1606_v40 }
0x1062   :  { %3502 = vmatprep.mubr.msk.f32.mxu1 %vm240_vm0, %v4917_v20 }
0x1063   :  { %3503 = vmatmul.mubr.msk.f32.vlgmr.msra.gmra.mrb[10].mxu1 %vm240_vm0, %v4919_v38 }
0x1136   :  { %v3504_v22 = vpop.f32.mrb[10].mxu1 }
0x1137   :  { %v4925_v23 = vadd.f32 %v3504_v22, %v3196_v21  ;;  %v1701_v24 = vpop.f32.mrb[11].mxu1 }
0x1138   :  { %v4927_v25 = vadd.f32 %v3196_v21, %v1701_v24 }
0x113a   :  { %3509 = vmatprep.mubr.msk.f32.mxu1 %vm384_vm1, %v4927_v25  ;;  %v4933_v26 = vpack.i.bf16 %v4925_v23, %v4927_v25 }
0x113c   :  { %3875 = vrot.lane.b32.xlu1 %v4933_v26, %s4346_s22  ;;  %3870 = vrot.lane.b32.xlu0 %v4933_v26, %s4347_s24 }
0x1140   :  { %1912 = vrot.lane.b32.xlu1 %v4927_v25, %s4348_s30 }
0x1144   :  { %1914 = vrot.lane.b32.xlu1 %v4925_v23, %s4348_s30 }
0x11ae   :  { %v3876_v62 = vpop.permute.xlu1 %3875  ;;  %v3871_v27 = vpop.permute.xlu0 %3870 }
0x11af   :  { %v3878_v28 = vunpack.i.h.bf16 %v3876_v62  ;;  %v3877_v29 = vunpack.i.l.bf16 %v3876_v62  ;;  %v3873_v61 = vunpack.i.h.bf16 %v3871_v27  ;;  %v3872_v30 = vunpack.i.l.bf16 %v3871_v27 }
0x11b1   :  { %v3712_v31 = vpack.c.bf16 %v3873_v61, %v3872_v30  ;;  %v3722_v32 = vpack.c.bf16 %v3878_v28, %v3877_v29 }
0x11b2   :  { %v1913_v34 = vpop.permute.xlu1 %1912 }
0x11b3   :  { %3714 = vmatprep.subr.msk.bf16.mxu1 %vm4733_vm2, %v3712_v31 }
0x11b4   :  { %3717 = vmatpush3.bf16.xpose.msk.msra.mxu1 %vm4733_vm2, %v3712_v31 }
0x11b5   :  { %3724 = vmatprep.subr.msk.bf16.mxu1 %vm4733_vm2, %v3722_v32 }
0x11b6   :  { %v1915_v36 = vpop.permute.xlu1 %1914 }
0x11bb   :  { %3510 = vmatmul.mubr.msk.f32.vlgmr.msra.gmra.mrb[12].mxu1 %vm384_vm1, %v4925_v23 }
0x11bc   :  { %3727 = vmatpush3.bf16.xpose.msk.msra.mxu1 %vm4733_vm2, %v3722_v32  ;;  %3523 = vmatprep.mubr.msk.f32.mxu1 %vm384_vm1, %v1913_v34 }
0x11c3   :  { %3524 = vmatmul.mubr.msk.f32.vlgmr.msra.gmra.mrb[14].mxu1 %vm384_vm1, %v1915_v36 }
0x128e   :  { %v3511_v37 = vpop.f32.mrb[12].mxu1 }
0x128f   :  { %v1800_v39 = vmul.f32 0.35355338, %v3511_v37  ;;  %v1790_v42 = vpop.f32.mrb[13].mxu1 }
0x1290   :  { %v1799_v43 = vmul.f32 0.35355338, %v1790_v42 }
0x1291   :  { %v1802_v44 = vadd.f32 %v1800_v39, %v4749_v54 }
0x1292   :  { %v1801_v45 = vadd.f32 %v1799_v43, %v4751_v57 }
0x1293   :  { %v1806_v46 = vsel %vm472_vm3, %v1802_v44, -inf }
0x1294   :  { %1807 = vmax.xlane.f32.xlu1 %v1806_v46  ;;  %v1803_v35 = vsel %vm472_vm3, %v1801_v45, -inf }
0x1295   :  { %1804 = vmax.xlane.f32.xlu0 %v1803_v35 }
0x1296   :  { %v3525_v33 = vpop.f32.mrb[14].mxu1 }
0x1297   :  { %v1994_v47 = vpop.f32.mrb[15].mxu1  ;;  %v2004_v49 = vmul.f32 0.35355338, %v3525_v33 }
0x1298   :  { %v2003_v50 = vmul.f32 0.35355338, %v1994_v47 }
0x1299   :  { %v2006_v53 = vadd.f32 %v2004_v49, %v4749_v54 }
0x129a   :  { %v2005_v51 = vadd.f32 %v2003_v50, %v4751_v57 }
0x129b   :  { %v2010_v55 = vsel %vm472_vm3, %v2006_v53, -inf }
0x129c   :  { %v2007_v52 = vsel %vm472_vm3, %v2005_v51, -inf }
0x129d   :  { %2008 = vmax.xlane.f32.xlu0 %v2007_v52 }
0x12a1   :  { %2011 = vmax.xlane.f32.xlu0 %v2010_v55 }
0x1321   :  { %v1808_v56 = vpop.xlane.xlu1 %1807 }
0x1322   :  { %v1810_v58 = vsub.f32 %v1802_v44, %v1808_v56  ;;  %v1805_v59 = vpop.xlane.xlu0 %1804 }
0x1323   :  { %v1809_v60 = vsub.f32 %v1801_v45, %v1805_v59 }
0x1324   :  { %v1813_v41 = vmul.f32 1.442695, %v1810_v58 }
0x1325   :  { %v1811_v63 = vmul.f32 1.442695, %v1809_v60 }
0x1326   :  { %3957 = vpow2.f32 %v1813_v41 }
0x1327   :  { %3959 = vpow2.f32 %v1811_v63 }
0x132a   :  { %v2009_v1 = vpop.xlane.xlu0 %2008 }
0x132b   :  { %v2013_v2 = vsub.f32 %v2005_v51, %v2009_v1  ;;  %v4003_v51 = vld [vmem:[#allocation5 + $0x8] sm:$0xff] }
0x132d   :  { %v2015_v3 = vmul.f32 1.442695, %v2013_v2 }
0x132e   :  { %v2012_v57 = vpop.xlane.xlu0 %2011 }
0x132f   :  { %3961 = vpow2.f32 %v2015_v3  ;;  %v2014_v4 = vsub.f32 %v2006_v53, %v2012_v57  ;;  %v4004_v53 = vld [vmem:[#allocation5] sm:$0xff] }
0x1330   :  { %v3958_v5 = vpop.eup %3957 }
0x1331   :  { %v3960_v54 = vpop.eup %3959  ;;  %v2017_v6 = vmul.f32 1.442695, %v2014_v4  ;;  %v1818_v7 = vsel %vm472_vm3, %v3958_v5, 0.0 }
0x1332   :  { %1819 = vadd.xlane.f32.xlu1 %v1818_v7  ;;  %v1815_v8 = vsel %vm472_vm3, %v3960_v54, 0.0 }
0x1333   :  { %3963 = vpow2.f32 %v2017_v6  ;;  %1816 = vadd.xlane.f32.xlu0 %v1815_v8 }
0x1339   :  { %v3962_v9 = vpop.eup %3961 }
0x133a   :  { %v2019_v0 = vsel %vm472_vm3, %v3962_v9, 0.0 }
0x133b   :  { %2020 = vadd.xlane.f32.xlu0 %v2019_v0 }
0x133d   :  { %v3964_v10 = vpop.eup %3963 }
0x133e   :  { %v2022_v11 = vsel %vm472_vm3, %v3964_v10, 0.0 }
0x133f   :  { %2023 = vadd.xlane.f32.xlu1 %v2022_v11 }
0x1350   :  { %3885 = vrot.lane.b32.xlu1 %v4933_v26, %s4349_s23 }
0x1351   :  { %3880 = vrot.lane.b32.xlu0 %v4933_v26, %s4350_s9 }
0x1354   :  { %3890 = vrot.lane.b32.xlu1 %v4933_v26, %s4351_s8  ;;  %s5191_s8 = smov 24  }
0x1355   :  { %2118 = vrot.lane.b32.xlu0 %v4925_v23, %s4352_s1 }
0x1358   :  { %2116 = vrot.lane.b32.xlu1 %v4927_v25, %s4352_s1 }
0x13bf   :  { %v1820_v13 = vpop.xlane.xlu1 %1819 }
0x13c0   :  { %v1817_v12 = vpop.xlane.xlu0 %1816 }
0x13c1   :  { %3965 = vrcp.f32 %v1817_v12 }
0x13c2   :  { %3967 = vrcp.f32 %v1820_v13 }
0x13c8   :  { %v2021_v14 = vpop.xlane.xlu0 %2020 }
0x13c9   :  { %3969 = vrcp.f32 %v2021_v14 }
0x13cb   :  { %v3966_v15 = vpop.eup %3965 }
0x13cc   :  { %v2024_v16 = vpop.xlane.xlu1 %2023  ;;  %v3881_v17 = vpop.permute.xlu0 %3880  ;;  %v1823_v18 = vmul.f32 %v3966_v15, %v3960_v54 }
0x13cd   :  { %3971 = vrcp.f32 %v2024_v16  ;;  %v3883_v19 = vunpack.i.h.bf16 %v3881_v17  ;;  %v3882_v40 = vunpack.i.l.bf16 %v3881_v17  ;;  %v3968_v22 = vpop.eup %3967 }
0x13ce   :  { %3516 = vmatprep.mubr.msk.f32.mxu0 %vm472_vm3, %v1823_v18  ;;  %v1824_v29 = vmul.f32 %v3968_v22, %v3958_v5 }
0x13cf   :  { %v3718_v21 = vpack.c.bf16 %v3883_v19, %v3882_v40 }
0x13d0   :  { %v3886_v24 = vpop.permute.xlu1 %3885  ;;  %v2119_v43 = vpop.permute.xlu0 %2118 }
0x13d1   :  { %v3888_v62 = vunpack.i.h.bf16 %v3886_v24  ;;  %v3887_v27 = vunpack.i.l.bf16 %v3886_v24  ;;  %3719 = vmatprep.subr.bf16.mxu0 %v3718_v21 }
0x13d2   :  { %3721 = vmatpush3.bf16.msra.mxu0 %v3718_v21 }
0x13d3   :  { %v3970_v28 = vpop.eup %3969  ;;  %v3728_v61 = vpack.c.bf16 %v3888_v62, %v3887_v27 }
0x13d4   :  { %v3891_v30 = vpop.permute.xlu1 %3890  ;;  %v2027_v31 = vmul.f32 %v3970_v28, %v3962_v9 }
0x13d5   :  { %v3893_v32 = vunpack.i.h.bf16 %v3891_v30  ;;  %v3892_v34 = vunpack.i.l.bf16 %v3891_v30  ;;  %3517 = vmatmul.mubr.msk.f32.vlgmr.msra.gmra.mrb[14].mxu0 %vm472_vm3, %v1824_v29  ;;  %3729 = vmatprep.subr.bf16.mxu0 %v3728_v61 }
0x13d6   :  { %3731 = vmatpush3.bf16.msra.mxu0 %v3728_v61  ;;  %3530 = vmatprep.mubr.msk.f32.mxu0 %vm472_vm3, %v2027_v31 }
0x13d7   :  { %v3972_v36 = vpop.eup %3971  ;;  %v3732_v37 = vpack.c.bf16 %v3893_v32, %v3892_v34 }
0x13d8   :  { %v2028_v39 = vmul.f32 %v3972_v36, %v3964_v10  ;;  %v2117_v42 = vpop.permute.xlu1 %2116 }
0x13d9   :  { %3734 = vmatprep.subr.msk.bf16.mxu0 %vm4733_vm2, %v3732_v37 }
0x13da   :  { %3531 = vmatmul.mubr.msk.f32.vlgmr.msra.gmra.mrb[16].mxu0 %vm472_vm3, %v2028_v39 }
0x13db   :  { %3537 = vmatprep.mubr.msk.f32.mxu0 %vm384_vm1, %v2117_v42 }
0x13df   :  { %3737 = vmatpush3.bf16.xpose.msk.msra.mxu0 %vm4733_vm2, %v3732_v37 }
0x13e6   :  { %3538 = vmatmul.mubr.msk.f32.vlgmr.msra.gmra.mrb[18].mxu0 %vm384_vm1, %v2119_v43 }
0x14a8   :  { %v4987_v44 = vpop.f32.mrb[14].mxu0 }
0x14a9   :  { %v4989_v45 = vpop.f32.mrb[15].mxu0 }
0x14ad   :  { %v4991_v46 = vpop.f32.mrb[16].mxu0 }
0x14ae   :  { %v4993_v35 = vpop.f32.mrb[17].mxu0 }
0x14b9   :  { %v3539_v33 = vpop.f32.mrb[18].mxu0 }
0x14ba   :  { %v2208_v47 = vmul.f32 0.35355338, %v3539_v33  ;;  %v2198_v49 = vpop.f32.mrb[19].mxu0 }
0x14bb   :  { %v2207_v50 = vmul.f32 0.35355338, %v2198_v49 }
0x14bc   :  { %v2210_v52 = vadd.f32 %v4003_v51, %v2208_v47 }
0x14bd   :  { %v2209_v55 = vadd.f32 %v4004_v53, %v2207_v50 }
0x14be   :  { %v2214_v56 = vsel %vm472_vm3, %v2210_v52, -inf }
0x14bf   :  { %2215 = vmax.xlane.f32.xlu0 %v2214_v56  ;;  %v2211_v58 = vsel %vm472_vm3, %v2209_v55, -inf  ;;  %v3225_v56 = vld [vmem:[%s5152_s6 + $0x30] sm:$0xff] }
0x14c0   :  { %2212 = vmax.xlane.f32.xlu1 %v2211_v58 }
0x14d1   :  { %3895 = vrot.lane.b32.xlu1 %v4933_v26, %s4353_s25 }
0x14d5   :  { %2320 = vrot.lane.b32.xlu1 %v4927_v25, %s4354_s2 }
0x14d9   :  { %2322 = vrot.lane.b32.xlu1 %v4925_v23, %s4354_s2 }
0x154c   :  { %v2216_v59 = vpop.xlane.xlu0 %2215 }
0x154d   :  { %v2218_v60 = vsub.f32 %v2210_v52, %v2216_v59  ;;  %v2213_v41 = vpop.xlane.xlu1 %2212  ;;  %v3226_v59 = vld [vmem:[%s5152_s6 + $0x38] sm:$0xff] }
0x154e   :  { %v2217_v63 = vsub.f32 %v2209_v55, %v2213_v41  ;;  %v3223_v55 = vld [vmem:[%s5152_s6 + $0x20] sm:$0xff] }
0x154f   :  { %v2221_v1 = vmul.f32 1.442695, %v2218_v60  ;;  %v3756_v60 = vpack.c.bf16 %v3226_v59, %v3225_v56  ;;  %v3243_v56 = vld [vmem:[%s5158_s12 + $0x60] sm:$0xff]  ;;  %v3244_v59 = vld [vmem:[%s5158_s12 + $0x68] sm:$0xff] }
0x1550   :  { %v2219_v2 = vmul.f32 1.442695, %v2217_v63 }
0x1551   :  { %3973 = vpow2.f32 %v2221_v1  ;;  %v3896_v3 = vpop.permute.xlu1 %3895 }
0x1552   :  { %v3898_v57 = vunpack.i.h.bf16 %v3896_v3  ;;  %v3897_v4 = vunpack.i.l.bf16 %v3896_v3  ;;  %3975 = vpow2.f32 %v2219_v2 }
0x1554   :  { %v3738_v5 = vpack.c.bf16 %v3898_v57, %v3897_v4 }
0x1555   :  { %v2321_v16 = vpop.permute.xlu1 %2320 }
0x1556   :  { %3739 = vmatprep.subr.bf16.mxu1 %v3738_v5 }
0x1557   :  { %3741 = vmatpush3.bf16.msra.mxu1 %v3738_v5 }
0x1559   :  { %v2323_v17 = vpop.permute.xlu1 %2322 }
0x155b   :  { %v3974_v54 = vpop.eup %3973 }
0x155c   :  { %v2226_v25 = vsel %vm472_vm3, %v3974_v54, 0.0  ;;  %v3976_v6 = vpop.eup %3975 }
0x155d   :  { %2227 = vadd.xlane.f32.xlu0 %v2226_v25  ;;  %v2223_v23 = vsel %vm472_vm3, %v3976_v6, 0.0 }
0x1561   :  { %2224 = vadd.xlane.f32.xlu0 %v2223_v23 }
0x1577   :  { %3900 = vrot.lane.b32.xlu0 %v4933_v26, %s4355_s21 }
0x15ea   :  { %v2228_v7 = vpop.xlane.xlu0 %2227 }
0x15eb   :  { %3977 = vrcp.f32 %v2228_v7 }
0x15ee   :  { %v2225_v8 = vpop.xlane.xlu0 %2224 }
0x15ef   :  { %3979 = vrcp.f32 %v2225_v8 }
0x15f2   :  { %v3901_v9 = vpop.permute.xlu0 %3900 }
0x15f3   :  { %v3903_v0 = vunpack.i.h.bf16 %v3901_v9  ;;  %v3902_v10 = vunpack.i.l.bf16 %v3901_v9  ;;  %v3227_v9 = vld [vmem:[#allocation11 + $0x1] ss:$0 sm:$0xff] }
0x15f5   :  { %v3742_v11 = vpack.c.bf16 %v3903_v0, %v3902_v10  ;;  %v3978_v12 = vpop.eup %3977 }
0x15f6   :  { %v2232_v15 = vmul.f32 %v3978_v12, %v3974_v54 }
0x15f7   :  { %3744 = vmatprep.subr.msk.bf16.mxu1 %vm4733_vm2, %v3742_v11 }
0x15f9   :  { %v3980_v13 = vpop.eup %3979 }
0x15fa   :  { %v2231_v14 = vmul.f32 %v3980_v13, %v3976_v6 }
0x15fc   :  { %3544 = vmatprep.mubr.msk.f32.mxu1 %vm472_vm3, %v2231_v14 }
0x15fd   :  { %3545 = vmatmul.mubr.msk.f32.vlgmr.msra.gmra.mrb[16].mxu1 %vm472_vm3, %v2232_v15 }
0x15fe   :  { %3747 = vmatpush3.bf16.xpose.msk.msra.mxu1 %vm4733_vm2, %v3742_v11  ;;  %3551 = vmatprep.mubr.msk.f32.mxu1 %vm384_vm1, %v2321_v16 }
0x1605   :  { %3552 = vmatmul.mubr.msk.f32.vlgmr.msra.gmra.mrb[18].mxu1 %vm384_vm1, %v2323_v17 }
0x16d0   :  { %v3546_v18 = vpop.f32.mrb[16].mxu1 }
0x16d1   :  { %v2311_v19 = vpop.f32.mrb[17].mxu1 }
0x16d8   :  { %v3553_v40 = vpop.f32.mrb[18].mxu1 }
0x16d9   :  { %v2412_v21 = vmul.f32 0.35355338, %v3553_v40  ;;  %v2402_v22 = vpop.f32.mrb[19].mxu1 }
0x16da   :  { %v2411_v24 = vmul.f32 0.35355338, %v2402_v22 }
0x16db   :  { %v2414_v62 = vadd.f32 %v4003_v51, %v2412_v21 }
0x16dc   :  { %v2413_v27 = vadd.f32 %v4004_v53, %v2411_v24 }
0x16dd   :  { %v2418_v28 = vsel %vm472_vm3, %v2414_v62, -inf }
0x16de   :  { %2419 = vmax.xlane.f32.xlu0 %v2418_v28  ;;  %v2415_v29 = vsel %vm472_vm3, %v2413_v27, -inf  ;;  %v3234_v28 = vld [vmem:[%s5156_s10 + $0x30] sm:$0xff] }
0x16df   :  { %2416 = vmax.xlane.f32.xlu1 %v2415_v29  ;;  %v3235_v29 = vld [vmem:[%s5156_s10 + $0x38] sm:$0xff] }
0x16f0   :  { %3905 = vrot.lane.b32.xlu1 %v4933_v26, %s4356_s14 }
0x16f4   :  { %2528 = vrot.lane.b32.xlu1 %v4991_v46, %s5185_s0 }
0x16f8   :  { %2534 = vrot.lane.b32.xlu1 %v2311_v19, %s4335_s26 }
0x16fc   :  { %2536 = vrot.lane.b32.xlu1 %v3546_v18, %s4335_s26 }
0x176b   :  { %v2420_v48 = vpop.xlane.xlu0 %2419 }
0x176c   :  { %v2422_v61 = vsub.f32 %v2414_v62, %v2420_v48  ;;  %v2417_v30 = vpop.xlane.xlu1 %2416  ;;  %v3233_v62 = vld [vmem:[%s5156_s10 + $0x28] sm:$0xff]  ;;  %v3764_v48 = vpack.c.bf16 %v3235_v29, %v3234_v28 }
0x176d   :  { %v2421_v31 = vsub.f32 %v2413_v27, %v2417_v30 }
0x176e   :  { %v2425_v32 = vmul.f32 1.442695, %v2422_v61 }
0x176f   :  { %v2423_v34 = vmul.f32 1.442695, %v2421_v31 }
0x1770   :  { %v3906_v36 = vpop.permute.xlu1 %3905 }
0x1771   :  { %3981 = vpow2.f32 %v2423_v34  ;;  %v3908_v37 = vunpack.i.h.bf16 %v3906_v36  ;;  %v3907_v39 = vunpack.i.l.bf16 %v3906_v36 }
0x1772   :  { %3983 = vpow2.f32 %v2425_v32 }
0x1773   :  { %v3748_v42 = vpack.c.bf16 %v3908_v37, %v3907_v39  ;;  %v3230_v39 = vld [vmem:[#allocation13 + $0x1] ss:$0 sm:$0xff] }
0x1774   :  { %v2529_v1 = vpop.permute.xlu1 %2528 }
0x1775   :  { %3749 = vmatprep.subr.bf16.mxu0 %v3748_v42  ;;  %v2549_v54 = vsel %vm384_vm1, %v4987_v44, %v2529_v1 }
0x1776   :  { %3751 = vmatpush3.bf16.msra.mxu0 %v3748_v42 }
0x1778   :  { %v2535_v2 = vpop.permute.xlu1 %2534 }
0x177b   :  { %v3982_v26 = vpop.eup %3981 }
0x177c   :  { %v2427_v43 = vsel %vm472_vm3, %v3982_v26, 0.0  ;;  %v3984_v46 = vpop.eup %3983  ;;  %v2537_v57 = vpop.permute.xlu1 %2536 }
0x177d   :  { %2428 = vadd.xlane.f32.xlu0 %v2427_v43  ;;  %v2430_v33 = vsel %vm472_vm3, %v3984_v46, 0.0  ;;  %v2551_v23 = vsel %vm472_vm3, %v2549_v54, %v2537_v57 }
0x1781   :  { %2431 = vadd.xlane.f32.xlu0 %v2430_v33 }
0x1797   :  { %2526 = vrot.lane.b32.xlu0 %v4993_v35, %s5185_s0  ;;  %v3224_v35 = vld [vmem:[%s5152_s6 + $0x28] sm:$0xff] }
0x1798   :  { %v3752_v58 = vpack.c.bf16 %v3224_v35, %v3223_v55  ;;  %v3241_v55 = vld [vmem:[%s5158_s12 + $0x50] sm:$0xff]  ;;  %v3242_v35 = vld [vmem:[%s5158_s12 + $0x58] sm:$0xff] }
0x179a   :  { %3753 = vmatprep.subr.bf16.mxu0 %v3752_v58 }
0x180a   :  { %v2429_v47 = vpop.xlane.xlu0 %2428 }
0x180b   :  { %3985 = vrcp.f32 %v2429_v47 }
0x180e   :  { %v2432_v49 = vpop.xlane.xlu0 %2431 }
0x180f   :  { %3987 = vrcp.f32 %v2432_v49 }
0x1812   :  { %v2527_v3 = vpop.permute.xlu0 %2526 }
0x1813   :  { %v2548_v4 = vsel %vm384_vm1, %v4989_v45, %v2527_v3 }
0x1814   :  { %v2550_v25 = vsel %vm472_vm3, %v2548_v4, %v2535_v2  ;;  %v3236_v2 = vld [vmem:[#allocation16 + $0x1] ss:$0 sm:$0xff] }
0x1815   :  { %v3986_v50 = vpop.eup %3985 }
0x1816   :  { %v2435_v51 = vmul.f32 %v3986_v50, %v3982_v26  ;;  %v3231_v26 = vld [vmem:[#allocation14 + $0x1] ss:$0 sm:$0xff] }
0x1818   :  { %3558 = vmatprep.mubr.msk.f32.mxu0 %vm472_vm3, %v2435_v51  ;;  %v3239_v51 = vld [vmem:[%s5158_s12 + $0x40] sm:$0xff] }
0x1819   :  { %v3988_v52 = vpop.eup %3987 }
0x181a   :  { %v2436_v53 = vmul.f32 %v3988_v52, %v3984_v46  ;;  %v3240_v52 = vld [vmem:[%s5158_s12 + $0x48] sm:$0xff] }
0x181c   :  { %3559 = vmatmul.mubr.msk.f32.vlgmr.msra.gmra.mrb[20].mxu0 %vm472_vm3, %v2436_v53  ;;  %v3768_v53 = vpack.c.bf16 %v3240_v52, %v3239_v51 }
0x181d   :  { %3755 = vmatpush3.bf16.msra.mxu0 %v3752_v58  ;;  %v3772_v58 = vpack.c.bf16 %v3242_v35, %v3241_v55 }
0x181e   :  { %3757 = vmatprep.subr.bf16.mxu0 %v3756_v60 }
0x1821   :  { %3759 = vmatpush3.bf16.msra.mxu0 %v3756_v60  ;;  %v3776_v60 = vpack.c.bf16 %v3244_v59, %v3243_v56  ;;  %v3250_v56 = vld [vmem:[#allocation19 + $0x1] ss:$0 sm:$0xff] }
0x1822   :  { %3769 = vmatprep.subr.bf16.mxu0 %v3768_v53 }
0x18ef   :  { %v3560_v41 = vpop.f32.mrb[20].mxu0 }
0x18f0   :  { %2544 = vrot.lane.b32.xlu1 %v3560_v41, %s5191_s8  ;;  %v2515_v63 = vpop.f32.mrb[21].mxu0  ;;  %v3245_v41 = vld [vmem:[%s5158_s12 + $0x70] sm:$0xff] }
0x18f1   :  { %2542 = vrot.lane.b32.xlu0 %v2515_v63, %s5191_s8  ;;  %v3246_v63 = vld [vmem:[%s5158_s12 + $0x78] sm:$0xff] }
0x18f2   :  { %v3780_v1 = vpack.c.bf16 %v3246_v63, %v3245_v41  ;;  %v3251_v41 = vld [vmem:[#allocation20 + $0x1] ss:$0 sm:$0xff] }
0x1962   :  { %v2545_v5 = vpop.permute.xlu1 %2544 }
0x1963   :  { %v2543_v6 = vpop.permute.xlu0 %2542  ;;  %v2553_v8 = vsel %vm1222_vm4, %v2551_v23, %v2545_v5 }
0x1964   :  { %v2552_v7 = vsel %vm1222_vm4, %v2550_v25, %v2543_v6 }
0x1965   :  { %3569 = vmatprep.mubr.msk.f32.mxu0 %vm240_vm0, %v2552_v7 }
0x1966   :  { %3570 = vmatmul.mubr.msk.f32.vlgmr.msra.gmra.mrb[22].mxu0 %vm240_vm0, %v2553_v8 }
0x1967   :  { %3771 = vmatpush3.bf16.msra.mxu0 %v3768_v53 }
0x1968   :  { %3773 = vmatprep.subr.bf16.mxu0 %v3772_v58 }
0x196b   :  { %3775 = vmatpush3.bf16.msra.mxu0 %v3772_v58 }
0x196c   :  { %3777 = vmatprep.subr.bf16.mxu0 %v3776_v60 }
0x196f   :  { %3779 = vmatpush3.bf16.msra.mxu0 %v3776_v60 }
0x1970   :  { %3781 = vmatprep.subr.bf16.mxu0 %v3780_v1 }
0x1973   :  { %3783 = vmatpush3.bf16.msra.mxu0 %v3780_v1 }
0x1a39   :  { %v3571_v0 = vpop.f32.mrb[22].mxu0 }
0x1a3a   :  { %v2645_v45 = vadd.f32 %v3571_v0, %v3227_v9  ;;  %v2639_v10 = vpop.f32.mrb[23].mxu0 }
0x1a3b   :  { %v2640_v11 = vadd.f32 %v3227_v9, %v2639_v10 }
0x1a3c   :  { %v2649_v44 = vadd.f32 %v2645_v45, %v4919_v38 }
0x1a3d   :  { %v2648_v12 = vadd.f32 %v2640_v11, %v4917_v20  ;;  %v3232_v20 = vld [vmem:[%s5156_s10 + $0x20] sm:$0xff] }
0x1a3e   :  { %v2657_v13 = vsel %vm240_vm0, %v2649_v44, 0.0  ;;  %v3760_v27 = vpack.c.bf16 %v3233_v62, %v3232_v20 }
0x1a3f   :  { %2658 = vadd.xlane.f32.xlu1 %v2657_v13  ;;  %v2654_v14 = vsel %vm240_vm0, %v2648_v12, 0.0 }
0x1a40   :  { %2655 = vadd.xlane.f32.xlu0 %v2654_v14  ;;  %3761 = vmatprep.subr.bf16.mxu1 %v3760_v27 }
0x1a41   :  { %3763 = vmatpush3.bf16.msra.mxu1 %v3760_v27 }
0x1a42   :  { %3765 = vmatprep.subr.bf16.mxu1 %v3764_v48 }
0x1a45   :  { %3767 = vmatpush3.bf16.msra.mxu1 %v3764_v48 }
0x1acc   :  { %v2659_v15 = vpop.xlane.xlu1 %2658 }
0x1acd   :  { %v2661_v16 = vmul.f32 0.03125, %v2659_v15  ;;  %v2656_v17 = vpop.xlane.xlu0 %2655 }
0x1ace   :  { %v2660_v18 = vmul.f32 0.03125, %v2656_v17 }
0x1acf   :  { %v2663_v19 = vsub.f32 %v2649_v44, %v2661_v16 }
0x1ad0   :  { %v2662_v40 = vsub.f32 %v2648_v12, %v2660_v18  ;;  %v3247_v18 = vld [vmem:[#allocation17 + $0x1] ss:$0 sm:$0xff] }
0x1ad1   :  { %v2665_v24 = vmul.f32 %v2663_v19, %v2663_v19 }
0x1ad2   :  { %v2664_v21 = vmul.f32 %v2662_v40, %v2662_v40 }
0x1ad3   :  { %v2669_v38 = vsel %vm240_vm0, %v2665_v24, 0.0 }
0x1ad4   :  { %v2666_v22 = vsel %vm240_vm0, %v2664_v21, 0.0 }
0x1ad5   :  { %2667 = vadd.xlane.f32.xlu0 %v2666_v22 }
0x1ad9   :  { %2670 = vadd.xlane.f32.xlu0 %v2669_v38 }
0x1b62   :  { %v2668_v61 = vpop.xlane.xlu0 %2667 }
0x1b63   :  { %v2672_v30 = vmul.f32 0.03125, %v2668_v61 }
0x1b65   :  { %v2674_v31 = vadd.f32 1e-12, %v2672_v30 }
0x1b66   :  { %v2671_v32 = vpop.xlane.xlu0 %2670 }
0x1b67   :  { %3989 = vrsqrt.f32 %v2674_v31  ;;  %v2673_v34 = vmul.f32 0.03125, %v2671_v32 }
0x1b69   :  { %v2675_v36 = vadd.f32 1e-12, %v2673_v34 }
0x1b6b   :  { %3991 = vrsqrt.f32 %v2675_v36 }
0x1b71   :  { %v3990_v37 = vpop.eup %3989 }
0x1b72   :  { %v2678_v42 = vmul.f32 %v3990_v37, %v2662_v40  ;;  %v2959_v37 = vld [vmem:[%s5162_s16] sm:$0xff] }
0x1b74   :  { %v2686_v43 = vmul.f32 %v3230_v39, %v2678_v42 }
0x1b75   :  { %v3992_v46 = vpop.eup %3991 }
0x1b76   :  { %v2679_v33 = vmul.f32 %v3992_v46, %v2663_v19  ;;  %v2694_v47 = vadd.f32 %v3231_v26, %v2686_v43  ;;  %v2961_v43 = vld [vmem:[%s5162_s16 + $0x10] sm:$0xff]  ;;  %v2962_v46 = vld [vmem:[%s5162_s16 + $0x18] sm:$0xff] }
0x1b78   :  { %v2687_v49 = vmul.f32 %v3230_v39, %v2679_v33  ;;  %3580 = vmatprep.mubr.msk.f32.mxu1 %vm240_vm0, %v2694_v47  ;;  %v2960_v39 = vld [vmem:[%s5162_s16 + $0x8] sm:$0xff]  ;;  %v3788_v33 = vpack.c.bf16 %v2962_v46, %v2961_v43 }
0x1b79   :  { %v3785_v42 = vpack.c.bf16 %v2960_v39, %v2959_v37 }
0x1b7a   :  { %v2695_v50 = vadd.f32 %v3231_v26, %v2687_v49  ;;  %v4358_v26 = vmov 0.0|0.0  }
0x1b7b   :  { %3784 = vmatprep.subr.bf16.mxu1 %v4358_v26 }
0x1b7c   :  { %3581 = vmatmul.mubr.msk.f32.vlgmr.msra.gmra.mrb[20].mxu1 %vm240_vm0, %v2695_v50 }
0x1b7d   :  { %3786 = vmatpush3.bf16.msra.mxu1 %v3785_v42 }
0x1b7e   :  { %3787 = vmatprep.subr.bf16.mxu1 %v4358_v26 }
0x1b81   :  { %3789 = vmatpush3.bf16.msra.mxu1 %v3788_v33 }
0x1b82   :  { %3790 = vmatprep.subr.bf16.mxu1 %v4358_v26 }
0x1c4f   :  { %v3582_v3 = vpop.f32.mrb[20].mxu1 }
0x1c50   :  { %v2787_v57 = vadd.f32 %v3582_v3, %v3236_v2  ;;  %v2781_v4 = vpop.f32.mrb[21].mxu1 }
0x1c51   :  { %v2782_v5 = vadd.f32 %v3236_v2, %v2781_v4 }
0x1c52   :  { %v2793_v54 = vmul.f32 0.044715, %v2787_v57  ;;  %v2791_v15 = vmul.f32 0.5, %v2787_v57 }
0x1c53   :  { %v2792_v25 = vmul.f32 0.044715, %v2782_v5  ;;  %v2790_v13 = vmul.f32 0.5, %v2782_v5 }
0x1c54   :  { %v2795_v6 = vmul.f32 %v2793_v54, %v2787_v57  ;;  %v3045_v54 = vld [vmem:[%s5164_s18 + $0x8] sm:$0xff] }
0x1c55   :  { %v2794_v23 = vmul.f32 %v2792_v25, %v2782_v5  ;;  %v3046_v25 = vld [vmem:[%s5164_s18 + $0x10] sm:$0xff] }
0x1c56   :  { %v2797_v7 = vmul.f32 %v2795_v6, %v2787_v57 }
0x1c57   :  { %v2796_v8 = vmul.f32 %v2794_v23, %v2782_v5  ;;  %v3047_v23 = vld [vmem:[%s5164_s18 + $0x18] sm:$0xff] }
0x1c58   :  { %v2799_v9 = vadd.f32 %v2797_v7, %v2787_v57  ;;  %v3794_v7 = vpack.c.bf16 %v3047_v23, %v3046_v25 }
0x1c59   :  { %v2798_v0 = vadd.f32 %v2796_v8, %v2782_v5  ;;  %v3044_v5 = vld [vmem:[%s5164_s18] sm:$0xff]  ;;  %v3252_v8 = vld [vmem:[#allocation22] ss:$0 sm:$0xff]  ;;  %s4291_s18 = scalar_lea.vmem %s3136_s3, 32 }
0x1c5a   :  { %v2801_v45 = vmul.f32 0.7978846, %v2799_v9  ;;  %v3791_v6 = vpack.c.bf16 %v3045_v54, %v3044_v5  ;;  %p4292_p6 = scmp.ne.s32.totalorder %s3136_s3, %s4291_s18  ;;  %p4297_p8 = scmp.lt.s32.totalorder %s4291_s18, %s4291_s18 }
0x1c5b   :  { %v2800_v10 = vmul.f32 0.7978846, %v2798_v0 }
0x1c5c   :  { %3993 = vtanh.f32 %v2801_v45  ;;  %p4298_p9 = por %p4297_p8, %p4296_p7 }
0x1c5d   :  { %3995 = vtanh.f32 %v2800_v10 }
0x1c5e   :  { %p4299_p10 = pnand %p4298_p9, %p4292_p6 }
0x1c66   :  { %v3994_v11 = vpop.eup %3993 }
0x1c67   :  { %v3996_v44 = vpop.eup %3995  ;;  %v2805_v12 = vadd.f32 1.0, %v3994_v11  ;;  %v3254_v11 = vld [vmem:[%s5165_s19] ss:$0 sm:$0xff] }
0x1c68   :  { %v2804_v14 = vadd.f32 1.0, %v3996_v44 }
0x1c69   :  { %v2807_v17 = vmul.f32 %v2805_v12, %v2791_v15 }
0x1c6a   :  { %v2806_v16 = vmul.f32 %v2804_v14, %v2790_v13 }
0x1c6c   :  { %3599 = vmatprep.mubr.msk.f32.mxu0 %vm1488_vm5, %v2806_v16 }
0x1c6d   :  { %3600 = vmatmul.mubr.msk.f32.vlgmr.msra.gmra.mrb[24].mxu0 %vm1488_vm5, %v2807_v17 }
0x1d40   :  { %v3601_v19 = vpop.f32.mrb[24].mxu0 }
0x1d41   :  { %v2903_v40 = vadd.f32 %v3601_v19, %v3247_v18  ;;  %v2897_v21 = vpop.f32.mrb[25].mxu0 }
0x1d42   :  { %v2898_v22 = vadd.f32 %v3247_v18, %v2897_v21 }
0x1d43   :  { %v2907_v24 = vadd.f32 %v2903_v40, %v2695_v50 }
0x1d44   :  { %v2906_v38 = vadd.f32 %v2898_v22, %v2694_v47  ;;  %v4360_v47 = vmov 0.0  }
0x1d45   :  { %v2915_v20 = vsel %vm240_vm0, %v2907_v24, 0.0  ;;  %3610 = vmatprep.mubr.msk.f32.mxu1 %vm4359_vm6, %v4360_v47 }
0x1d46   :  { %2916 = vadd.xlane.f32.xlu0 %v2915_v20  ;;  %v2912_v62 = vsel %vm240_vm0, %v2906_v38, 0.0 }
0x1d47   :  { %2913 = vadd.xlane.f32.xlu1 %v2912_v62 }
0x1dd3   :  { %v2917_v27 = vpop.xlane.xlu0 %2916 }
0x1dd4   :  { %v2919_v28 = vmul.f32 0.03125, %v2917_v27  ;;  %v2914_v29 = vpop.xlane.xlu1 %2913 }
0x1dd5   :  { %v2918_v48 = vmul.f32 0.03125, %v2914_v29 }
0x1dd6   :  { %v2921_v61 = vsub.f32 %v2907_v24, %v2919_v28 }
0x1dd7   :  { %v2920_v30 = vsub.f32 %v2906_v38, %v2918_v48 }
0x1dd8   :  { %v2923_v31 = vmul.f32 %v2921_v61, %v2921_v61 }
0x1dd9   :  { %v2922_v32 = vmul.f32 %v2920_v30, %v2920_v30 }
0x1dda   :  { %v2927_v34 = vsel %vm240_vm0, %v2923_v31, 0.0 }
0x1ddb   :  { %2928 = vadd.xlane.f32.xlu0 %v2927_v34  ;;  %v2924_v36 = vsel %vm240_vm0, %v2922_v32, 0.0 }
0x1ddc   :  { %2925 = vadd.xlane.f32.xlu1 %v2924_v36 }
0x1e68   :  { %v2929_v49 = vpop.xlane.xlu0 %2928 }
0x1e69   :  { %v2931_v50 = vmul.f32 0.03125, %v2929_v49  ;;  %v2926_v51 = vpop.xlane.xlu1 %2925 }
0x1e6a   :  { %v2930_v52 = vmul.f32 0.03125, %v2926_v51 }
0x1e6b   :  { %v2933_v53 = vadd.f32 1e-12, %v2931_v50 }
0x1e6c   :  { %v2932_v55 = vadd.f32 1e-12, %v2930_v52 }
0x1e6d   :  { %3997 = vrsqrt.f32 %v2933_v53 }
0x1e6e   :  { %3999 = vrsqrt.f32 %v2932_v55 }
0x1e77   :  { %v3998_v35 = vpop.eup %3997 }
0x1e78   :  { %v4000_v58 = vpop.eup %3999  ;;  %v2937_v59 = vmul.f32 %v3998_v35, %v2921_v61 }
0x1e79   :  { %v2936_v60 = vmul.f32 %v4000_v58, %v2920_v30 }
0x1e7a   :  { %v2945_v63 = vmul.f32 %v3250_v56, %v2937_v59 }
0x1e7b   :  { %v2944_v1 = vmul.f32 %v3250_v56, %v2936_v60 }
0x1e7c   :  { %v2953_v2 = vadd.f32 %v3251_v41, %v2945_v63 }
0x1e7d   :  { %v2952_v3 = vadd.f32 %v3251_v41, %v2944_v1 }
0x1e7e   :  { %v2955_v57 = vrot.slane %v2953_v2, 7 }
0x1e80   :  { %v2958_v4 = vsel %vm2957_vm7, %v2952_v3, %v2955_v57 }
0x1e81   :  { %3611 = vmatmul.mubr.msk.f32.vlgmr.msra.gmra.mrb[22].mxu1 %vm240_vm0, %v2958_v4 }
0x1e82   :  { %3621 = vmatprep.mubr.msk.f32.mxu1 %vm4359_vm6, %v4360_v47  ;;  %3792 = vmatpush3.bf16.msra.mxu1 %v3791_v6 }
0x1e83   :  { %3793 = vmatprep.subr.bf16.mxu1 %v4358_v26 }
0x1e86   :  { %3795 = vmatpush3.bf16.msra.mxu1 %v3794_v7 }
0x1f54   :  { %v3039_v9 = vpop.f32.mrb[22].mxu1 }
0x1f55   :  { %v3040_v0 = vadd.f32 %v3252_v8, %v3039_v9  ;;  %v3612_v45 = vpop.f32.mrb[23].mxu1 }
0x1f57   :  { %4001 = vtanh.f32 %v3040_v0 }
0x1f61   :  { %v4002_v10 = vpop.eup %4001 }
0x1f62   :  { %3622 = vmatmul.mubr.msk.f32.vlgmr.msra.gmra.mrb[24].mxu1 %vm240_vm0, %v4002_v10 }
0x2035   :  { %v3124_v44 = vpop.f32.mrb[24].mxu1 }
0x2036   :  { %v3125_v12 = vadd.f32 %v3254_v11, %v3124_v44  ;;  %v3623_v13 = vpop.f32.mrb[25].mxu1 }
0x2038   :  { %3128 = vst [vmem:[#allocation23] sm:$0x3] %v3125_v12 }
0x2039   :  { %4302 = shalt.err (!%p4299_p10)
}
0x203a   :  { %s4303_s13 = scalar_lea.hbm %s5166_s20, 32 }
0x203b   :  { %p4304_p11 = scmp.ne.s32.totalorder %s5166_s20, %s4303_s13  ;;  %p4307_p12 = scmp.lt.u32.totalorder %s4303_s13, %s5166_s20 }
0x203d   :  { %p4309_p13 = pnand %p4307_p12, %p4304_p11 }
0x203f   :  { %4312 = shalt.err (!%p4309_p13)
}
0x2040   :  { %3138 = dma.vmem_to_hbm [thread:$0]  %s3136_s3, 32, %s5166_s20, [#allocation4]  }
0x2041   :  { %4327 = dma.done.wait [#allocation4], 32  }
0x2042   :  { %4328 = vsyncadd [#allocation4], 4294967264 }
0x2043   :  { %3142 = vsyncpa [#allocation3], 1 }
0x2044   :  { %3143 = vsyncpa [#allocation6], 1 }
0x2045   :  { %3144 = vsyncpa [#allocation9], 1 }
0x2046   :  { %3145 = vsyncpa [#allocation12], 1 }
0x2047   :  { %3146 = vsyncpa [#allocation15], 1 }
0x2048   :  { %3147 = vsyncpa [#allocation18], 1 }
0x2049   :  { %3148 = vsyncpa [#allocation21], 1 }
0x204a   :  { %3149 = vsyncpa [#allocation4], 1 }

</bundles_post_ra>
